<compile_context>
chip_gen: v6e
topology: v6e:2x2x1
jax: 0.10.0
libtpu: 0.0.40
codegen_flags: <defaults>
</compile_context>

<pallas_src>
import functools

import jax
import jax.numpy as jnp
from jax import lax
from jax.experimental import pallas as pl
from jax.experimental.pallas import tpu as pltpu

LANE = 128


def _round_up(n, m):
    return ((n + m - 1) // m) * m


def _pad2d(a, rows, cols):
    r, c = a.shape
    return jnp.pad(a, ((0, rows - r), (0, cols - c)))


# ----------------------------------------------------------------------------
# Per-generation configuration (VMEM limit, tile size, resident-support budget)
# ----------------------------------------------------------------------------
def _tpu_vmem_bytes():
    try:
        info = pltpu.get_tpu_info()
        for name in ("vmem_capacity_bytes", "vmem_size_bytes", "vmem_bytes"):
            val = getattr(info, name, None)
            if val:
                return int(val)
    except Exception:
        pass
    return 64 * 1024 * 1024  # conservative fallback: assume v7x-class VMEM


def _config():
    vmem = _tpu_vmem_bytes()
    # Leave headroom under the physical capacity; scale budgets with it.
    vmem_limit = min(int(vmem * 0.75), 112 * 1024 * 1024)
    tile = 512 if vmem >= 96 * 1024 * 1024 else 256   # v5e/v6e vs v7x
    return dict(vmem_limit=vmem_limit, tile=tile,
                support_budget=vmem_limit // 2)


# ----------------------------------------------------------------------------
# Fused AE (8 linears) + student-t soft assignment kernel (row-tiled)
# ----------------------------------------------------------------------------
def _ae_q_kernel(x_ref,
                 w1, b1, w2, b2, w3, b3, wz, bz,
                 wd1, bd1, wd2, bd2, wd3, bd3, wxb, bxb,
                 mut_ref, mu2_ref,
                 xbar_ref, tra1_ref, tra2_ref, tra3_ref, z_ref, q_ref,
                 *, v, n_clusters):
    def lin(h, w_ref, b_ref, relu):
        # bf16 MXU inputs, f32 accumulate; bias/ReLU in f32.
        y = jnp.dot(h.astype(jnp.bfloat16), w_ref[...],
                    preferred_element_type=jnp.float32) + b_ref[...]
        return jnp.maximum(y, 0.0) if relu else y

    x = x_ref[...]                                  # bf16
    t1 = lin(x, w1, b1, True)
    t2 = lin(t1, w2, b2, True)
    t3 = lin(t2, w3, b3, True)
    z = lin(t3, wz, bz, False)                      # f32 in-kernel
    tra1_ref[...] = t1.astype(tra1_ref.dtype)       # bf16 inter-layer carries
    tra2_ref[...] = t2.astype(tra2_ref.dtype)
    tra3_ref[...] = t3.astype(tra3_ref.dtype)
    z_ref[...] = z.astype(z_ref.dtype)

    d1 = lin(z, wd1, bd1, True)
    d2 = lin(d1, wd2, bd2, True)
    d3 = lin(d2, wd3, bd3, True)
    xbar_ref[...] = lin(d3, wxb, bxb, False)        # f32 output

    # Student-t soft assignment, fused while z is still VMEM-resident.
    # dist2 = ||z||^2 + ||mu||^2 - 2 z @ mu^T   (MXU, no [N,K,nz] broadcast);
    # ||mu||^2 is precomputed in the wrapper (mu2_ref).
    cross = jnp.dot(z.astype(jnp.bfloat16), mut_ref[...],
                    preferred_element_type=jnp.float32)      # [tm, K_pad]
    z2 = jnp.sum(z * z, axis=1, keepdims=True)                # [tm, 1]
    dist2 = jnp.maximum(z2 + mu2_ref[...] - 2.0 * cross, 0.0)
    q = 1.0 / (1.0 + dist2 / v)
    if v != 1.0:                                    # v == 1 -> exponent is 1
        q = q ** ((v + 1.0) / 2.0)
    col = lax.broadcasted_iota(jnp.int32, q.shape, 1)
    q = jnp.where(col < n_clusters, q, 0.0)         # mask padded clusters
    # exact row normalization (once per tile, nearly free)
    q_ref[...] = q / jnp.sum(q, axis=1, keepdims=True)


def _ae_q_call(x_p, params, v, tm, vmem_limit):
    dims = params["dims"]
    n_pad, n_in_p = x_p.shape
    mu_t = params["cluster_t"]           # [nz_pad, K_pad] bf16
    mu2 = params["cluster_sq"]           # [1, K_pad] f32
    kp = mu_t.shape[1]

    layer_names = ["enc_1", "enc_2", "enc_3", "z_layer",
                   "dec_1", "dec_2", "dec_3", "x_bar"]
    ins = [x_p]
    in_specs = [pl.BlockSpec((tm, n_in_p), lambda i: (i, 0))]
    feat = []
    for name in layer_names:
        w, b = params[name]
        ins += [w, b]
        in_specs += [pl.BlockSpec(w.shape, lambda i: (0, 0)),
                     pl.BlockSpec(b.shape, lambda i: (0, 0))]
        feat.append(w.shape[1])
    ins += [mu_t, mu2]
    in_specs += [pl.BlockSpec(mu_t.shape, lambda i: (0, 0)),
                 pl.BlockSpec(mu2.shape, lambda i: (0, 0))]

    n1p, n2p, n3p, nzp = feat[0], feat[1], feat[2], feat[3]
    out_feats = [n_in_p, n1p, n2p, n3p, nzp, kp]    # x_bar, tra1..3, z, q
    out_dtypes = [jnp.float32, jnp.bfloat16, jnp.bfloat16, jnp.bfloat16,
                  jnp.bfloat16, jnp.float32]
    out_shape = [jax.ShapeDtypeStruct((n_pad, f), d)
                 for f, d in zip(out_feats, out_dtypes)]
    out_specs = [pl.BlockSpec((tm, f), lambda i: (i, 0)) for f in out_feats]

    return pl.pallas_call(
        functools.partial(_ae_q_kernel, v=float(v),
                          n_clusters=dims["n_clusters"]),
        out_shape=out_shape,
        grid_spec=pltpu.PrefetchScalarGridSpec(
            num_scalar_prefetch=0,
            grid=(n_pad // tm,),
            in_specs=in_specs,
            out_specs=out_specs),
        compiler_params=pltpu.CompilerParams(
            dimension_semantics=("parallel",),
            vmem_limit_bytes=vmem_limit),
    )(*ins)


# ----------------------------------------------------------------------------
# GNN layer, pass (a): support S = (xa [+ xb]) @ W  (computed once per row)
# ----------------------------------------------------------------------------
def _support_kernel(*refs, has_residual):
    if has_residual:
        xa_ref, xb_ref, w_ref, o_ref = refs
        x = xa_ref[...] + xb_ref[...]               # residual add fused (bf16)
    else:
        xa_ref, w_ref, o_ref = refs
        x = xa_ref[...]
    o_ref[...] = jnp.dot(x, w_ref[...],
                         preferred_element_type=jnp.float32).astype(o_ref.dtype)


def _support_call(xa, xb, w_bf16, *, tm, vmem_limit):
    n_pad, fin_p = xa.shape
    fout_p = w_bf16.shape[1]

    ins = [xa]
    in_specs = [pl.BlockSpec((tm, fin_p), lambda i: (i, 0))]
    if xb is not None:
        ins.append(xb)
        in_specs.append(pl.BlockSpec((tm, fin_p), lambda i: (i, 0)))
    ins.append(w_bf16)
    in_specs.append(pl.BlockSpec(w_bf16.shape, lambda i: (0, 0)))

    return pl.pallas_call(
        functools.partial(_support_kernel, has_residual=xb is not None),
        out_shape=jax.ShapeDtypeStruct((n_pad, fout_p), jnp.bfloat16),
        grid_spec=pltpu.PrefetchScalarGridSpec(
            num_scalar_prefetch=0,
            grid=(n_pad // tm,),
            in_specs=in_specs,
            out_specs=pl.BlockSpec((tm, fout_p), lambda i: (i, 0))),
        compiler_params=pltpu.CompilerParams(
            dimension_semantics=("parallel",),
            vmem_limit_bytes=vmem_limit),
    )(*ins)


# ----------------------------------------------------------------------------
# GNN layer, pass (b): out = adj @ S, epilogue relu / softmax / none
# ----------------------------------------------------------------------------
def _adj_kernel(sup_ref, adj_ref, o_ref, acc_ref, *, mode, n_valid,
                resident, tk):
    k = pl.program_id(1)

    @pl.when(k == 0)
    def _():
        acc_ref[...] = jnp.zeros_like(acc_ref)

    if resident:
        # full support matrix is VMEM-resident; slice the contraction chunk
        start = pl.multiple_of(k * tk, tk)
        sup = sup_ref[pl.ds(start, tk), :]
    else:
        sup = sup_ref[...]
    acc_ref[...] += jnp.dot(adj_ref[...], sup,
                            preferred_element_type=jnp.float32)

    @pl.when(k == pl.num_programs(1) - 1)
    def _():
        acc = acc_ref[...]
        if mode == "relu":
            o_ref[...] = jnp.maximum(acc, 0.0).astype(o_ref.dtype)
        elif mode == "softmax":
            col = lax.broadcasted_iota(jnp.int32, acc.shape, 1)
            s = jnp.where(col < n_valid, acc, -jnp.inf)   # mask padded lanes
            m = jnp.max(s, axis=1, keepdims=True)
            e = jnp.exp(s - m)
            o_ref[...] = (e / jnp.sum(e, axis=1, keepdims=True)).astype(o_ref.dtype)
        else:
            o_ref[...] = acc.astype(o_ref.dtype)


def _adj_contract_call(support, adj_p, *, mode, n_valid, tm, tk,
                       vmem_limit, support_budget):
    n_pad, fout_p = support.shape
    out_dtype = jnp.float32 if mode == "softmax" else jnp.bfloat16
    # Keep S fully VMEM-resident if it fits the per-generation budget
    # (x2 for worst-case double buffering); otherwise stream (tk, fout) tiles.
    resident = (2 * n_pad * fout_p * 2) <= support_budget
    if resident:
        sup_spec = pl.BlockSpec((n_pad, fout_p), lambda i, k: (0, 0))
    else:
        sup_spec = pl.BlockSpec((tk, fout_p), lambda i, k: (k, 0))

    return pl.pallas_call(
        functools.partial(_adj_kernel, mode=mode, n_valid=n_valid,
                          resident=resident, tk=tk),
        out_shape=jax.ShapeDtypeStruct((n_pad, fout_p), out_dtype),
        grid_spec=pltpu.PrefetchScalarGridSpec(
            num_scalar_prefetch=0,
            grid=(n_pad // tm, n_pad // tk),
            in_specs=[sup_spec,
                      pl.BlockSpec((tm, tk), lambda i, k: (i, k))],
            out_specs=pl.BlockSpec((tm, fout_p), lambda i, k: (i, 0)),
            scratch_shapes=[pltpu.VMEM((tm, fout_p), jnp.float32)]),
        compiler_params=pltpu.CompilerParams(
            dimension_semantics=("parallel", "arbitrary"),
            vmem_limit_bytes=vmem_limit),
    )(support, adj_p)


# ----------------------------------------------------------------------------
# Parameters (deterministic, xavier-style), padded lane-dense, bf16 weights
# ----------------------------------------------------------------------------
def _xavier(key, fan_in, fan_out):
    std = (2.0 / (fan_in + fan_out)) ** 0.5
    return std * jax.random.normal(key, (fan_in, fan_out), jnp.float32)


def make_params(key, n_input, n_1, n_2, n_3, n_z, n_d1, n_d2, n_d3, n_clusters):
    keys = jax.random.split(key, 16)

    def lin_p(k, fi, fo):
        w = _xavier(k, fi, fo)
        wp = _pad2d(w, _round_up(fi, LANE), _round_up(fo, LANE)).astype(jnp.bfloat16)
        bp = jnp.zeros((1, _round_up(fo, LANE)), jnp.float32)
        return wp, bp

    def gnn_w(k, fi, fo):
        w = _xavier(k, fi, fo)
        return _pad2d(w, _round_up(fi, LANE), _round_up(fo, LANE)).astype(jnp.bfloat16)

    p = {}
    p["enc_1"] = lin_p(keys[0], n_input, n_1)
    p["enc_2"] = lin_p(keys[1], n_1, n_2)
    p["enc_3"] = lin_p(keys[2], n_2, n_3)
    p["z_layer"] = lin_p(keys[3], n_3, n_z)
    p["dec_1"] = lin_p(keys[4], n_z, n_d1)
    p["dec_2"] = lin_p(keys[5], n_d1, n_d2)
    p["dec_3"] = lin_p(keys[6], n_d2, n_d3)
    p["x_bar"] = lin_p(keys[7], n_d3, n_input)
    p["gnn_1"] = gnn_w(keys[8], n_input, n_1)
    p["gnn_2"] = gnn_w(keys[9], n_1, n_2)
    p["gnn_3"] = gnn_w(keys[10], n_2, n_3)
    p["gnn_4"] = gnn_w(keys[11], n_3, n_z)
    p["gnn_5"] = gnn_w(keys[12], n_z, n_clusters)

    mu = _xavier(keys[13], n_clusters, n_z)          # xavier_normal_ on [K, n_z]
    mu_t_p = _pad2d(mu.T, _round_up(n_z, LANE), _round_up(n_clusters, LANE))
    p["cluster_t"] = mu_t_p.astype(jnp.bfloat16)     # [nz_pad, K_pad] bf16
    mu_f = p["cluster_t"].astype(jnp.float32)
    p["cluster_sq"] = jnp.sum(mu_f * mu_f, axis=0, keepdims=True)  # [1, K_pad]
    p["dims"] = dict(n_input=n_input, n_z=n_z, n_clusters=n_clusters)
    return p


# ----------------------------------------------------------------------------
# SDCN forward
# ----------------------------------------------------------------------------
def prepare_inputs(x, adj, *, n_input, tm):
    """Pad + cast once (hoist out of the training loop and reuse — the adj
    pad/convert touches O(N^2) HBM bytes per call)."""
    n = x.shape[0]
    n_pad = _round_up(n, tm)
    n_in_p = _round_up(n_input, LANE)
    x_p = _pad2d(x, n_pad, n_in_p).astype(jnp.bfloat16)
    adj_p = _pad2d(adj, n_pad, n_pad).astype(jnp.bfloat16)
    return x_p, adj_p


def sdcn_forward(params, x, adj, v=1.0):
    cfg = _config()
    dims = params["dims"]
    n = x.shape[0]
    tm = cfg["tile"] if n >= cfg["tile"] else 128    # row / contraction tiles
    tk = tm

    x_p, adj_p = prepare_inputs(x, adj, n_input=dims["n_input"], tm=tm)

    # --- fused AE + soft assignment (one pallas_call) ---
    x_bar_p, tra1_p, tra2_p, tra3_p, z_p, q_p = _ae_q_call(
        x_p, params, v, tm, cfg["vmem_limit"])

    # --- GCN branch: per layer, support pass (residual add + X@W, once) then
    #     adj contraction (only N^2 stream); final softmax fused in epilogue ---
    def gnn(xa, xb, w, mode, n_valid=0):
        support = _support_call(xa, xb, w, tm=tm, vmem_limit=cfg["vmem_limit"])
        return _adj_contract_call(
            support, adj_p, mode=mode, n_valid=n_valid, tm=tm, tk=tk,
            vmem_limit=cfg["vmem_limit"], support_budget=cfg["support_budget"])

    h1 = gnn(x_p, None, params["gnn_1"], "relu")
    h2 = gnn(h1, tra1_p, params["gnn_2"], "relu")
    h3 = gnn(h2, tra2_p, params["gnn_3"], "relu")
    h4 = gnn(h3, tra3_p, params["gnn_4"], "relu")
    predict_p = gnn(h4, z_p, params["gnn_5"], "softmax",
                    n_valid=dims["n_clusters"])

    # strip padding
    x_bar = x_bar_p[:n, :dims["n_input"]]
    q = q_p[:n, :dims["n_clusters"]]
    predict = predict_p[:n, :dims["n_clusters"]]
    z = z_p[:n, :dims["n_z"]].astype(jnp.float32)
    return x_bar, q, predict, z


# ----------------------------------------------------------------------------
# Demo
# ----------------------------------------------------------------------------
if __name__ == "__main__":
    N = 16
    n_input = 32
    n_1, n_2, n_3 = 64, 32, 16
    n_z = 8
    n_d1, n_d2, n_d3 = 16, 32, 64
    n_clusters = 4
    v = 1.0

    key = jax.random.PRNGKey(0)
    k_param, k_x, k_adj = jax.random.split(key, 3)

    params = make_params(k_param, n_input, n_1, n_2, n_3, n_z,
                         n_d1, n_d2, n_d3, n_clusters)

    x = jax.random.normal(k_x, (N, n_input), jnp.float32)

    # Dense row-normalized adjacency (A + I, row-normalized) standing in for
    # the sparse normalized adjacency used by torch.spmm.
    a = (jax.random.uniform(k_adj, (N, N)) > 0.7).astype(jnp.float32)
    a = jnp.maximum(a, a.T) + jnp.eye(N, dtype=jnp.float32)
    adj = a / jnp.sum(a, axis=1, keepdims=True)

    x_bar, q, predict, z = sdcn_forward(params, x, adj, v)
    jax.block_until_ready((x_bar, q, predict, z))

    assert x_bar.shape == (N, n_input)
    assert q.shape == (N, n_clusters)
    assert predict.shape == (N, n_clusters)
    assert z.shape == (N, n_z)
    assert bool(jnp.all(jnp.isfinite(x_bar)))
    assert bool(jnp.all(jnp.isfinite(q)))
    assert bool(jnp.all(jnp.isfinite(predict)))
    assert bool(jnp.all(jnp.isfinite(z)))
    # row sums of the two distributions should be ~1 (exact division used)
    assert bool(jnp.all(jnp.abs(jnp.sum(q, axis=1) - 1.0) < 1e-3))
    assert bool(jnp.all(jnp.abs(jnp.sum(predict, axis=1) - 1.0) < 1e-3))

    print("KERNEL_OK")
</pallas_src>

<mosaic_0001>
module attributes {stable_mosaic.version = 11 : i64} {
  func.func @_ae_q_kernel(%arg0: i32, %arg1: memref<128x128xbf16, #tpu.memory_space<vmem>>, %arg2: memref<128x128xbf16, #tpu.memory_space<vmem>>, %arg3: memref<1x128xf32, #tpu.memory_space<vmem>>, %arg4: memref<128x128xbf16, #tpu.memory_space<vmem>>, %arg5: memref<1x128xf32, #tpu.memory_space<vmem>>, %arg6: memref<128x128xbf16, #tpu.memory_space<vmem>>, %arg7: memref<1x128xf32, #tpu.memory_space<vmem>>, %arg8: memref<128x128xbf16, #tpu.memory_space<vmem>>, %arg9: memref<1x128xf32, #tpu.memory_space<vmem>>, %arg10: memref<128x128xbf16, #tpu.memory_space<vmem>>, %arg11: memref<1x128xf32, #tpu.memory_space<vmem>>, %arg12: memref<128x128xbf16, #tpu.memory_space<vmem>>, %arg13: memref<1x128xf32, #tpu.memory_space<vmem>>, %arg14: memref<128x128xbf16, #tpu.memory_space<vmem>>, %arg15: memref<1x128xf32, #tpu.memory_space<vmem>>, %arg16: memref<128x128xbf16, #tpu.memory_space<vmem>>, %arg17: memref<1x128xf32, #tpu.memory_space<vmem>>, %arg18: memref<128x128xbf16, #tpu.memory_space<vmem>>, %arg19: memref<1x128xf32, #tpu.memory_space<vmem>>, %arg20: memref<128x128xf32, #tpu.memory_space<vmem>>, %arg21: memref<128x128xbf16, #tpu.memory_space<vmem>>, %arg22: memref<128x128xbf16, #tpu.memory_space<vmem>>, %arg23: memref<128x128xbf16, #tpu.memory_space<vmem>>, %arg24: memref<128x128xbf16, #tpu.memory_space<vmem>>, %arg25: memref<128x128xf32, #tpu.memory_space<vmem>>) attributes {dimension_semantics = [#tpu.dimension_semantics<parallel>], iteration_bounds = array<i64: 1>, scalar_prefetch = 0 : i64, scratch_operands = 0 : i64, tpu.core_type = #tpu.core_type<tc>, window_params = [{transform_indices = @transform_0, window_bounds = array<i64: 128, 128>}, {pipeline_mode = #tpu.pipeline_mode<synchronous>, transform_indices = @transform_1, window_bounds = array<i64: 128, 128>}, {pipeline_mode = #tpu.pipeline_mode<synchronous>, transform_indices = @transform_2, window_bounds = array<i64: 1, 128>}, {pipeline_mode = #tpu.pipeline_mode<synchronous>, transform_indices = @transform_3, window_bounds = array<i64: 128, 128>}, {pipeline_mode = #tpu.pipeline_mode<synchronous>, transform_indices = @transform_4, window_bounds = array<i64: 1, 128>}, {pipeline_mode = #tpu.pipeline_mode<synchronous>, transform_indices = @transform_5, window_bounds = array<i64: 128, 128>}, {pipeline_mode = #tpu.pipeline_mode<synchronous>, transform_indices = @transform_6, window_bounds = array<i64: 1, 128>}, {pipeline_mode = #tpu.pipeline_mode<synchronous>, transform_indices = @transform_7, window_bounds = array<i64: 128, 128>}, {pipeline_mode = #tpu.pipeline_mode<synchronous>, transform_indices = @transform_8, window_bounds = array<i64: 1, 128>}, {pipeline_mode = #tpu.pipeline_mode<synchronous>, transform_indices = @transform_9, window_bounds = array<i64: 128, 128>}, {pipeline_mode = #tpu.pipeline_mode<synchronous>, transform_indices = @transform_10, window_bounds = array<i64: 1, 128>}, {pipeline_mode = #tpu.pipeline_mode<synchronous>, transform_indices = @transform_11, window_bounds = array<i64: 128, 128>}, {pipeline_mode = #tpu.pipeline_mode<synchronous>, transform_indices = @transform_12, window_bounds = array<i64: 1, 128>}, {pipeline_mode = #tpu.pipeline_mode<synchronous>, transform_indices = @transform_13, window_bounds = array<i64: 128, 128>}, {pipeline_mode = #tpu.pipeline_mode<synchronous>, transform_indices = @transform_14, window_bounds = array<i64: 1, 128>}, {pipeline_mode = #tpu.pipeline_mode<synchronous>, transform_indices = @transform_15, window_bounds = array<i64: 128, 128>}, {pipeline_mode = #tpu.pipeline_mode<synchronous>, transform_indices = @transform_16, window_bounds = array<i64: 1, 128>}, {pipeline_mode = #tpu.pipeline_mode<synchronous>, transform_indices = @transform_17, window_bounds = array<i64: 128, 128>}, {pipeline_mode = #tpu.pipeline_mode<synchronous>, transform_indices = @transform_18, window_bounds = array<i64: 1, 128>}, {transform_indices = @transform_19, window_bounds = array<i64: 128, 128>}, {transform_indices = @transform_20, window_bounds = array<i64: 128, 128>}, {transform_indices = @transform_21, window_bounds = array<i64: 128, 128>}, {transform_indices = @transform_22, window_bounds = array<i64: 128, 128>}, {transform_indices = @transform_23, window_bounds = array<i64: 128, 128>}, {transform_indices = @transform_24, window_bounds = array<i64: 128, 128>}]} {
    %c0 = arith.constant 0 : index
    %c0_0 = arith.constant 0 : index
    %0 = vector.load %arg1[%c0, %c0_0] : memref<128x128xbf16, #tpu.memory_space<vmem>>, vector<128x128xbf16>
    %c0_1 = arith.constant 0 : index
    %c0_2 = arith.constant 0 : index
    %1 = vector.load %arg2[%c0_1, %c0_2] : memref<128x128xbf16, #tpu.memory_space<vmem>>, vector<128x128xbf16>
    %cst = arith.constant dense<0.000000e+00> : vector<128x128xf32>
    %2 = tpu.matmul %0, %1, %cst {dimension_numbers = #tpu.dot_dimension_numbers<[1], [0], [0], [1], [0, 0, 1, 1], [], []>} : vector<128x128xbf16>, vector<128x128xbf16>, vector<128x128xf32> -> vector<128x128xf32>
    %c0_3 = arith.constant 0 : index
    %c0_4 = arith.constant 0 : index
    %3 = vector.load %arg3[%c0_3, %c0_4] : memref<1x128xf32, #tpu.memory_space<vmem>>, vector<1x128xf32>
    %4 = vector.broadcast %3 : vector<1x128xf32> to vector<128x128xf32>
    %5 = arith.addf %2, %4 : vector<128x128xf32>
    %cst_5 = arith.constant 0.000000e+00 : f32
    %6 = vector.broadcast %cst_5 : f32 to vector<128x128xf32>
    %7 = arith.maximumf %5, %6 : vector<128x128xf32>
    %8 = arith.truncf %7 : vector<128x128xf32> to vector<128x128xbf16>
    %c0_6 = arith.constant 0 : index
    %c0_7 = arith.constant 0 : index
    %9 = vector.load %arg4[%c0_6, %c0_7] : memref<128x128xbf16, #tpu.memory_space<vmem>>, vector<128x128xbf16>
    %cst_8 = arith.constant dense<0.000000e+00> : vector<128x128xf32>
    %10 = tpu.matmul %8, %9, %cst_8 {dimension_numbers = #tpu.dot_dimension_numbers<[1], [0], [0], [1], [0, 0, 1, 1], [], []>} : vector<128x128xbf16>, vector<128x128xbf16>, vector<128x128xf32> -> vector<128x128xf32>
    %c0_9 = arith.constant 0 : index
    %c0_10 = arith.constant 0 : index
    %11 = vector.load %arg5[%c0_9, %c0_10] : memref<1x128xf32, #tpu.memory_space<vmem>>, vector<1x128xf32>
    %12 = vector.broadcast %11 : vector<1x128xf32> to vector<128x128xf32>
    %13 = arith.addf %10, %12 : vector<128x128xf32>
    %cst_11 = arith.constant 0.000000e+00 : f32
    %14 = vector.broadcast %cst_11 : f32 to vector<128x128xf32>
    %15 = arith.maximumf %13, %14 : vector<128x128xf32>
    %16 = arith.truncf %15 : vector<128x128xf32> to vector<128x128xbf16>
    %c0_12 = arith.constant 0 : index
    %c0_13 = arith.constant 0 : index
    %17 = vector.load %arg6[%c0_12, %c0_13] : memref<128x128xbf16, #tpu.memory_space<vmem>>, vector<128x128xbf16>
    %cst_14 = arith.constant dense<0.000000e+00> : vector<128x128xf32>
    %18 = tpu.matmul %16, %17, %cst_14 {dimension_numbers = #tpu.dot_dimension_numbers<[1], [0], [0], [1], [0, 0, 1, 1], [], []>} : vector<128x128xbf16>, vector<128x128xbf16>, vector<128x128xf32> -> vector<128x128xf32>
    %c0_15 = arith.constant 0 : index
    %c0_16 = arith.constant 0 : index
    %19 = vector.load %arg7[%c0_15, %c0_16] : memref<1x128xf32, #tpu.memory_space<vmem>>, vector<1x128xf32>
    %20 = vector.broadcast %19 : vector<1x128xf32> to vector<128x128xf32>
    %21 = arith.addf %18, %20 : vector<128x128xf32>
    %cst_17 = arith.constant 0.000000e+00 : f32
    %22 = vector.broadcast %cst_17 : f32 to vector<128x128xf32>
    %23 = arith.maximumf %21, %22 : vector<128x128xf32>
    %24 = arith.truncf %23 : vector<128x128xf32> to vector<128x128xbf16>
    %c0_18 = arith.constant 0 : index
    %c0_19 = arith.constant 0 : index
    %25 = vector.load %arg8[%c0_18, %c0_19] : memref<128x128xbf16, #tpu.memory_space<vmem>>, vector<128x128xbf16>
    %cst_20 = arith.constant dense<0.000000e+00> : vector<128x128xf32>
    %26 = tpu.matmul %24, %25, %cst_20 {dimension_numbers = #tpu.dot_dimension_numbers<[1], [0], [0], [1], [0, 0, 1, 1], [], []>} : vector<128x128xbf16>, vector<128x128xbf16>, vector<128x128xf32> -> vector<128x128xf32>
    %c0_21 = arith.constant 0 : index
    %c0_22 = arith.constant 0 : index
    %27 = vector.load %arg9[%c0_21, %c0_22] : memref<1x128xf32, #tpu.memory_space<vmem>>, vector<1x128xf32>
    %28 = vector.broadcast %27 : vector<1x128xf32> to vector<128x128xf32>
    %29 = arith.addf %26, %28 : vector<128x128xf32>
    %30 = arith.truncf %7 : vector<128x128xf32> to vector<128x128xbf16>
    %c0_23 = arith.constant 0 : index
    %c0_24 = arith.constant 0 : index
    %31 = vector.load %arg21[%c0_23, %c0_24] : memref<128x128xbf16, #tpu.memory_space<vmem>>, vector<128x128xbf16>
    tpu.vector_store %arg21[%c0_23, %c0_24], %30 {strides = array<i32>} : memref<128x128xbf16, #tpu.memory_space<vmem>>, vector<128x128xbf16>,
    %32 = arith.truncf %15 : vector<128x128xf32> to vector<128x128xbf16>
    %c0_25 = arith.constant 0 : index
    %c0_26 = arith.constant 0 : index
    %33 = vector.load %arg22[%c0_25, %c0_26] : memref<128x128xbf16, #tpu.memory_space<vmem>>, vector<128x128xbf16>
    tpu.vector_store %arg22[%c0_25, %c0_26], %32 {strides = array<i32>} : memref<128x128xbf16, #tpu.memory_space<vmem>>, vector<128x128xbf16>,
    %34 = arith.truncf %23 : vector<128x128xf32> to vector<128x128xbf16>
    %c0_27 = arith.constant 0 : index
    %c0_28 = arith.constant 0 : index
    %35 = vector.load %arg23[%c0_27, %c0_28] : memref<128x128xbf16, #tpu.memory_space<vmem>>, vector<128x128xbf16>
    tpu.vector_store %arg23[%c0_27, %c0_28], %34 {strides = array<i32>} : memref<128x128xbf16, #tpu.memory_space<vmem>>, vector<128x128xbf16>,
    %36 = arith.truncf %29 : vector<128x128xf32> to vector<128x128xbf16>
    %c0_29 = arith.constant 0 : index
    %c0_30 = arith.constant 0 : index
    %37 = vector.load %arg24[%c0_29, %c0_30] : memref<128x128xbf16, #tpu.memory_space<vmem>>, vector<128x128xbf16>
    tpu.vector_store %arg24[%c0_29, %c0_30], %36 {strides = array<i32>} : memref<128x128xbf16, #tpu.memory_space<vmem>>, vector<128x128xbf16>,
    %38 = arith.truncf %29 : vector<128x128xf32> to vector<128x128xbf16>
    %c0_31 = arith.constant 0 : index
    %c0_32 = arith.constant 0 : index
    %39 = vector.load %arg10[%c0_31, %c0_32] : memref<128x128xbf16, #tpu.memory_space<vmem>>, vector<128x128xbf16>
    %cst_33 = arith.constant dense<0.000000e+00> : vector<128x128xf32>
    %40 = tpu.matmul %38, %39, %cst_33 {dimension_numbers = #tpu.dot_dimension_numbers<[1], [0], [0], [1], [0, 0, 1, 1], [], []>} : vector<128x128xbf16>, vector<128x128xbf16>, vector<128x128xf32> -> vector<128x128xf32>
    %c0_34 = arith.constant 0 : index
    %c0_35 = arith.constant 0 : index
    %41 = vector.load %arg11[%c0_34, %c0_35] : memref<1x128xf32, #tpu.memory_space<vmem>>, vector<1x128xf32>
    %42 = vector.broadcast %41 : vector<1x128xf32> to vector<128x128xf32>
    %43 = arith.addf %40, %42 : vector<128x128xf32>
    %cst_36 = arith.constant 0.000000e+00 : f32
    %44 = vector.broadcast %cst_36 : f32 to vector<128x128xf32>
    %45 = arith.maximumf %43, %44 : vector<128x128xf32>
    %46 = arith.truncf %45 : vector<128x128xf32> to vector<128x128xbf16>
    %c0_37 = arith.constant 0 : index
    %c0_38 = arith.constant 0 : index
    %47 = vector.load %arg12[%c0_37, %c0_38] : memref<128x128xbf16, #tpu.memory_space<vmem>>, vector<128x128xbf16>
    %cst_39 = arith.constant dense<0.000000e+00> : vector<128x128xf32>
    %48 = tpu.matmul %46, %47, %cst_39 {dimension_numbers = #tpu.dot_dimension_numbers<[1], [0], [0], [1], [0, 0, 1, 1], [], []>} : vector<128x128xbf16>, vector<128x128xbf16>, vector<128x128xf32> -> vector<128x128xf32>
    %c0_40 = arith.constant 0 : index
    %c0_41 = arith.constant 0 : index
    %49 = vector.load %arg13[%c0_40, %c0_41] : memref<1x128xf32, #tpu.memory_space<vmem>>, vector<1x128xf32>
    %50 = vector.broadcast %49 : vector<1x128xf32> to vector<128x128xf32>
    %51 = arith.addf %48, %50 : vector<128x128xf32>
    %cst_42 = arith.constant 0.000000e+00 : f32
    %52 = vector.broadcast %cst_42 : f32 to vector<128x128xf32>
    %53 = arith.maximumf %51, %52 : vector<128x128xf32>
    %54 = arith.truncf %53 : vector<128x128xf32> to vector<128x128xbf16>
    %c0_43 = arith.constant 0 : index
    %c0_44 = arith.constant 0 : index
    %55 = vector.load %arg14[%c0_43, %c0_44] : memref<128x128xbf16, #tpu.memory_space<vmem>>, vector<128x128xbf16>
    %cst_45 = arith.constant dense<0.000000e+00> : vector<128x128xf32>
    %56 = tpu.matmul %54, %55, %cst_45 {dimension_numbers = #tpu.dot_dimension_numbers<[1], [0], [0], [1], [0, 0, 1, 1], [], []>} : vector<128x128xbf16>, vector<128x128xbf16>, vector<128x128xf32> -> vector<128x128xf32>
    %c0_46 = arith.constant 0 : index
    %c0_47 = arith.constant 0 : index
    %57 = vector.load %arg15[%c0_46, %c0_47] : memref<1x128xf32, #tpu.memory_space<vmem>>, vector<1x128xf32>
    %58 = vector.broadcast %57 : vector<1x128xf32> to vector<128x128xf32>
    %59 = arith.addf %56, %58 : vector<128x128xf32>
    %cst_48 = arith.constant 0.000000e+00 : f32
    %60 = vector.broadcast %cst_48 : f32 to vector<128x128xf32>
    %61 = arith.maximumf %59, %60 : vector<128x128xf32>
    %62 = arith.truncf %61 : vector<128x128xf32> to vector<128x128xbf16>
    %c0_49 = arith.constant 0 : index
    %c0_50 = arith.constant 0 : index
    %63 = vector.load %arg16[%c0_49, %c0_50] : memref<128x128xbf16, #tpu.memory_space<vmem>>, vector<128x128xbf16>
    %cst_51 = arith.constant dense<0.000000e+00> : vector<128x128xf32>
    %64 = tpu.matmul %62, %63, %cst_51 {dimension_numbers = #tpu.dot_dimension_numbers<[1], [0], [0], [1], [0, 0, 1, 1], [], []>} : vector<128x128xbf16>, vector<128x128xbf16>, vector<128x128xf32> -> vector<128x128xf32>
    %c0_52 = arith.constant 0 : index
    %c0_53 = arith.constant 0 : index
    %65 = vector.load %arg17[%c0_52, %c0_53] : memref<1x128xf32, #tpu.memory_space<vmem>>, vector<1x128xf32>
    %66 = vector.broadcast %65 : vector<1x128xf32> to vector<128x128xf32>
    %67 = arith.addf %64, %66 : vector<128x128xf32>
    %c0_54 = arith.constant 0 : index
    %c0_55 = arith.constant 0 : index
    %68 = vector.load %arg20[%c0_54, %c0_55] : memref<128x128xf32, #tpu.memory_space<vmem>>, vector<128x128xf32>
    tpu.vector_store %arg20[%c0_54, %c0_55], %67 {strides = array<i32>} : memref<128x128xf32, #tpu.memory_space<vmem>>, vector<128x128xf32>,
    %69 = arith.truncf %29 : vector<128x128xf32> to vector<128x128xbf16>
    %c0_56 = arith.constant 0 : index
    %c0_57 = arith.constant 0 : index
    %70 = vector.load %arg18[%c0_56, %c0_57] : memref<128x128xbf16, #tpu.memory_space<vmem>>, vector<128x128xbf16>
    %cst_58 = arith.constant dense<0.000000e+00> : vector<128x128xf32>
    %71 = tpu.matmul %69, %70, %cst_58 {dimension_numbers = #tpu.dot_dimension_numbers<[1], [0], [0], [1], [0, 0, 1, 1], [], []>} : vector<128x128xbf16>, vector<128x128xbf16>, vector<128x128xf32> -> vector<128x128xf32>
    %72 = arith.mulf %29, %29 : vector<128x128xf32>
    %cst_59 = arith.constant dense<0.000000e+00> : vector<128xf32>
    %73 = vector.multi_reduction <add>, %72, %cst_59 [1] : vector<128x128xf32> to vector<128xf32>
    %74 = vector.shape_cast %73 : vector<128xf32> to vector<128x1xf32>
    %c0_60 = arith.constant 0 : index
    %c0_61 = arith.constant 0 : index
    %75 = vector.load %arg19[%c0_60, %c0_61] : memref<1x128xf32, #tpu.memory_space<vmem>>, vector<1x128xf32>
    %76 = vector.broadcast %74 : vector<128x1xf32> to vector<128x128xf32>
    %77 = vector.broadcast %75 : vector<1x128xf32> to vector<128x128xf32>
    %78 = arith.addf %76, %77 : vector<128x128xf32>
    %cst_62 = arith.constant 2.000000e+00 : f32
    %79 = vector.broadcast %cst_62 : f32 to vector<128x128xf32>
    %80 = arith.mulf %79, %71 : vector<128x128xf32>
    %81 = arith.subf %78, %80 : vector<128x128xf32>
    %cst_63 = arith.constant 0.000000e+00 : f32
    %82 = vector.broadcast %cst_63 : f32 to vector<128x128xf32>
    %83 = arith.maximumf %81, %82 : vector<128x128xf32>
    %cst_64 = arith.constant 1.000000e+00 : f32
    %84 = vector.broadcast %cst_64 : f32 to vector<128x128xf32>
    %85 = arith.divf %83, %84 : vector<128x128xf32>
    %cst_65 = arith.constant 1.000000e+00 : f32
    %86 = vector.broadcast %cst_65 : f32 to vector<128x128xf32>
    %87 = arith.addf %86, %85 : vector<128x128xf32>
    %cst_66 = arith.constant 1.000000e+00 : f32
    %88 = vector.broadcast %cst_66 : f32 to vector<128x128xf32>
    %89 = arith.divf %88, %87 : vector<128x128xf32>
    %90 = tpu.iota {dimensions = array<i32: 1>} : vector<128x128xi32>
    %c4_i32 = arith.constant 4 : i32
    %91 = vector.broadcast %c4_i32 : i32 to vector<128x128xi32>
    %92 = arith.cmpi slt, %90, %91 : vector<128x128xi32>
    %cst_67 = arith.constant 0.000000e+00 : f32
    %93 = vector.broadcast %cst_67 : f32 to vector<128x128xf32>
    %94 = arith.select %92, %89, %93 : vector<128x128xi1>, vector<128x128xf32>
    %cst_68 = arith.constant dense<0.000000e+00> : vector<128xf32>
    %95 = vector.multi_reduction <add>, %94, %cst_68 [1] : vector<128x128xf32> to vector<128xf32>
    %96 = vector.shape_cast %95 : vector<128xf32> to vector<128x1xf32>
    %97 = vector.broadcast %96 : vector<128x1xf32> to vector<128x128xf32>
    %98 = arith.divf %94, %97 : vector<128x128xf32>
    %c0_69 = arith.constant 0 : index
    %c0_70 = arith.constant 0 : index
    %99 = vector.load %arg25[%c0_69, %c0_70] : memref<128x128xf32, #tpu.memory_space<vmem>>, vector<128x128xf32>
    tpu.vector_store %arg25[%c0_69, %c0_70], %98 {strides = array<i32>} : memref<128x128xf32, #tpu.memory_space<vmem>>, vector<128x128xf32>,
    return
  }
  func.func @transform_0(%arg0: i32) -> (i32, i32) {
    %c0_i32 = arith.constant 0 : i32
    %c0_i32_0 = arith.constant 0 : i32
    return %arg0, %c0_i32 : i32, i32
  }
  func.func @transform_1(%arg0: i32) -> (i32, i32) {
    %c0_i32 = arith.constant 0 : i32
    %c0_i32_0 = arith.constant 0 : i32
    %c0_i32_1 = arith.constant 0 : i32
    return %c0_i32, %c0_i32_0 : i32, i32
  }
  func.func @transform_2(%arg0: i32) -> (i32, i32) {
    %c0_i32 = arith.constant 0 : i32
    %c0_i32_0 = arith.constant 0 : i32
    %c0_i32_1 = arith.constant 0 : i32
    return %c0_i32, %c0_i32_0 : i32, i32
  }
  func.func @transform_3(%arg0: i32) -> (i32, i32) {
    %c0_i32 = arith.constant 0 : i32
    %c0_i32_0 = arith.constant 0 : i32
    %c0_i32_1 = arith.constant 0 : i32
    return %c0_i32, %c0_i32_0 : i32, i32
  }
  func.func @transform_4(%arg0: i32) -> (i32, i32) {
    %c0_i32 = arith.constant 0 : i32
    %c0_i32_0 = arith.constant 0 : i32
    %c0_i32_1 = arith.constant 0 : i32
    return %c0_i32, %c0_i32_0 : i32, i32
  }
  func.func @transform_5(%arg0: i32) -> (i32, i32) {
    %c0_i32 = arith.constant 0 : i32
    %c0_i32_0 = arith.constant 0 : i32
    %c0_i32_1 = arith.constant 0 : i32
    return %c0_i32, %c0_i32_0 : i32, i32
  }
  func.func @transform_6(%arg0: i32) -> (i32, i32) {
    %c0_i32 = arith.constant 0 : i32
    %c0_i32_0 = arith.constant 0 : i32
    %c0_i32_1 = arith.constant 0 : i32
    return %c0_i32, %c0_i32_0 : i32, i32
  }
  func.func @transform_7(%arg0: i32) -> (i32, i32) {
    %c0_i32 = arith.constant 0 : i32
    %c0_i32_0 = arith.constant 0 : i32
    %c0_i32_1 = arith.constant 0 : i32
    return %c0_i32, %c0_i32_0 : i32, i32
  }
  func.func @transform_8(%arg0: i32) -> (i32, i32) {
    %c0_i32 = arith.constant 0 : i32
    %c0_i32_0 = arith.constant 0 : i32
    %c0_i32_1 = arith.constant 0 : i32
    return %c0_i32, %c0_i32_0 : i32, i32
  }
  func.func @transform_9(%arg0: i32) -> (i32, i32) {
    %c0_i32 = arith.constant 0 : i32
    %c0_i32_0 = arith.constant 0 : i32
    %c0_i32_1 = arith.constant 0 : i32
    return %c0_i32, %c0_i32_0 : i32, i32
  }
  func.func @transform_10(%arg0: i32) -> (i32, i32) {
    %c0_i32 = arith.constant 0 : i32
    %c0_i32_0 = arith.constant 0 : i32
    %c0_i32_1 = arith.constant 0 : i32
    return %c0_i32, %c0_i32_0 : i32, i32
  }
  func.func @transform_11(%arg0: i32) -> (i32, i32) {
    %c0_i32 = arith.constant 0 : i32
    %c0_i32_0 = arith.constant 0 : i32
    %c0_i32_1 = arith.constant 0 : i32
    return %c0_i32, %c0_i32_0 : i32, i32
  }
  func.func @transform_12(%arg0: i32) -> (i32, i32) {
    %c0_i32 = arith.constant 0 : i32
    %c0_i32_0 = arith.constant 0 : i32
    %c0_i32_1 = arith.constant 0 : i32
    return %c0_i32, %c0_i32_0 : i32, i32
  }
  func.func @transform_13(%arg0: i32) -> (i32, i32) {
    %c0_i32 = arith.constant 0 : i32
    %c0_i32_0 = arith.constant 0 : i32
    %c0_i32_1 = arith.constant 0 : i32
    return %c0_i32, %c0_i32_0 : i32, i32
  }
  func.func @transform_14(%arg0: i32) -> (i32, i32) {
    %c0_i32 = arith.constant 0 : i32
    %c0_i32_0 = arith.constant 0 : i32
    %c0_i32_1 = arith.constant 0 : i32
    return %c0_i32, %c0_i32_0 : i32, i32
  }
  func.func @transform_15(%arg0: i32) -> (i32, i32) {
    %c0_i32 = arith.constant 0 : i32
    %c0_i32_0 = arith.constant 0 : i32
    %c0_i32_1 = arith.constant 0 : i32
    return %c0_i32, %c0_i32_0 : i32, i32
  }
  func.func @transform_16(%arg0: i32) -> (i32, i32) {
    %c0_i32 = arith.constant 0 : i32
    %c0_i32_0 = arith.constant 0 : i32
    %c0_i32_1 = arith.constant 0 : i32
    return %c0_i32, %c0_i32_0 : i32, i32
  }
  func.func @transform_17(%arg0: i32) -> (i32, i32) {
    %c0_i32 = arith.constant 0 : i32
    %c0_i32_0 = arith.constant 0 : i32
    %c0_i32_1 = arith.constant 0 : i32
    return %c0_i32, %c0_i32_0 : i32, i32
  }
  func.func @transform_18(%arg0: i32) -> (i32, i32) {
    %c0_i32 = arith.constant 0 : i32
    %c0_i32_0 = arith.constant 0 : i32
    %c0_i32_1 = arith.constant 0 : i32
    return %c0_i32, %c0_i32_0 : i32, i32
  }
  func.func @transform_19(%arg0: i32) -> (i32, i32) {
    %c0_i32 = arith.constant 0 : i32
    %c0_i32_0 = arith.constant 0 : i32
    return %arg0, %c0_i32 : i32, i32
  }
  func.func @transform_20(%arg0: i32) -> (i32, i32) {
    %c0_i32 = arith.constant 0 : i32
    %c0_i32_0 = arith.constant 0 : i32
    return %arg0, %c0_i32 : i32, i32
  }
  func.func @transform_21(%arg0: i32) -> (i32, i32) {
    %c0_i32 = arith.constant 0 : i32
    %c0_i32_0 = arith.constant 0 : i32
    return %arg0, %c0_i32 : i32, i32
  }
  func.func @transform_22(%arg0: i32) -> (i32, i32) {
    %c0_i32 = arith.constant 0 : i32
    %c0_i32_0 = arith.constant 0 : i32
    return %arg0, %c0_i32 : i32, i32
  }
  func.func @transform_23(%arg0: i32) -> (i32, i32) {
    %c0_i32 = arith.constant 0 : i32
    %c0_i32_0 = arith.constant 0 : i32
    return %arg0, %c0_i32 : i32, i32
  }
  func.func @transform_24(%arg0: i32) -> (i32, i32) {
    %c0_i32 = arith.constant 0 : i32
    %c0_i32_0 = arith.constant 0 : i32
    return %arg0, %c0_i32 : i32, i32
  }
}

</mosaic_0001>

<bundles_post_ra>
// kernel: tpu_custom_call.1
= control target key start
LH: loop header
LB: loop body
LE: loop exit
PB: predicated region body
PF: predicated region fallthrough
CT: control target
= control target key end

     0   :  { %s4568_s0 = inlined_call_operand.hbm [shape: bf16[128,128], index: 0, kind: input, shape index: {}]   ;;  %s4569_s1 = inlined_call_operand.hbm [shape: bf16[128,128], index: 1, kind: input, shape index: {}]   ;;  %s4570_s2 = inlined_call_operand.vmem [shape: f32[1,128], index: 2, kind: input, shape index: {}]   ;;  %s4571_s3 = inlined_call_operand.hbm [shape: bf16[128,128], index: 3, kind: input, shape index: {}]   ;;  %s4572_s4 = inlined_call_operand.vmem [shape: f32[1,128], index: 4, kind: input, shape index: {}]   ;;  %s4573_s5 = inlined_call_operand.hbm [shape: bf16[128,128], index: 5, kind: input, shape index: {}]   ;;  %s4574_s6 = inlined_call_operand.vmem [shape: f32[1,128], index: 6, kind: input, shape index: {}]   ;;  %s4575_s7 = inlined_call_operand.hbm [shape: bf16[128,128], index: 7, kind: input, shape index: {}]   ;;  %s4576_s8 = inlined_call_operand.vmem [shape: f32[1,128], index: 8, kind: input, shape index: {}]   ;;  %s4577_s9 = inlined_call_operand.hbm [shape: bf16[128,128], index: 9, kind: input, shape index: {}]   ;;  %s4578_s10 = inlined_call_operand.vmem [shape: f32[1,128], index: 10, kind: input, shape index: {}]   ;;  %s4579_s11 = inlined_call_operand.hbm [shape: bf16[128,128], index: 11, kind: input, shape index: {}]   ;;  %s4580_s12 = inlined_call_operand.vmem [shape: f32[1,128], index: 12, kind: input, shape index: {}]   ;;  %s4581_s13 = inlined_call_operand.hbm [shape: bf16[128,128], index: 13, kind: input, shape index: {}]   ;;  %s4582_s14 = inlined_call_operand.vmem [shape: f32[1,128], index: 14, kind: input, shape index: {}]   ;;  %s4583_s15 = inlined_call_operand.hbm [shape: bf16[128,128], index: 15, kind: input, shape index: {}]   ;;  %s4584_s16 = inlined_call_operand.vmem [shape: f32[1,128], index: 16, kind: input, shape index: {}]   ;;  %s4585_s17 = inlined_call_operand.hbm [shape: bf16[128,128], index: 17, kind: input, shape index: {}]   ;;  %s4586_s18 = inlined_call_operand.vmem [shape: f32[1,128], index: 18, kind: input, shape index: {}]   ;;  %s4587_s19 = inlined_call_operand.hbm [shape: f32[128,128], index: 19, kind: output, shape index: {0}]   ;;  %s4588_s20 = inlined_call_operand.hbm [shape: bf16[128,128], index: 20, kind: output, shape index: {1}]   ;;  %s4589_s21 = inlined_call_operand.hbm [shape: bf16[128,128], index: 21, kind: output, shape index: {2}]   ;;  %s4590_s22 = inlined_call_operand.hbm [shape: bf16[128,128], index: 22, kind: output, shape index: {3}]   ;;  %s4591_s23 = inlined_call_operand.hbm [shape: bf16[128,128], index: 23, kind: output, shape index: {4}]   ;;  %s4592_s24 = inlined_call_operand.hbm [shape: f32[128,128], index: 24, kind: output, shape index: {5}]  }
   0x1   :  { %4593 = sst [smem:[#allocation38_spill]] %s4568_s0 }
   0x2   :  { %4594 = sst [smem:[#allocation39_spill]] %s4569_s1 }
   0x3   :  { %4595 = sst [smem:[#allocation40_spill]] %s4570_s2 }
   0x4   :  { %4596 = sst [smem:[#allocation41_spill]] %s4571_s3 }
   0x5   :  { %4597 = sst [smem:[#allocation42_spill]] %s4572_s4 }
   0x6   :  { %4598 = sst [smem:[#allocation43_spill]] %s4573_s5 }
   0x7   :  { %4599 = sst [smem:[#allocation44_spill]] %s4574_s6 }
   0x8   :  { %4600 = sst [smem:[#allocation45_spill]] %s4575_s7 }
   0x9   :  { %4601 = sst [smem:[#allocation46_spill]] %s4576_s8 }
   0xa   :  { %30 = vsyncpa [#allocation3], 0 }
   0xb   :  { %31 = vsyncpa [#allocation6], 0 }
   0xc   :  { %32 = vsyncpa [#allocation9], 0 }
   0xd   :  { %33 = vsyncpa [#allocation12], 0 }
   0xe   :  { %34 = vsyncpa [#allocation15], 0 }
   0xf   :  { %35 = vsyncpa [#allocation18], 0 }
  0x10   :  { %36 = vsyncpa [#allocation4], 0 }
  0x11   :  { %37 = vsyncpa [#allocation21], 0 }
  0x12   :  { %38 = vsyncpa [#allocation24], 0 }
  0x13   :  { %39 = vsyncpa [#allocation27], 0  ;;  %s3957_s5 = smov [#allocation5]   ;;  %s3958_s27 = smov [#allocation8]  }
  0x14   :  { %s57_s26 = sshll.u32 %s3957_s5, 4  ;;  %s85_s28 = sshll.u32 %s3958_s27, 4  ;;  %s58_s26 = int_to_ptr.vmem [resolvable:$true] %s57_s26  ;;  %s86_s28 = int_to_ptr.vmem [resolvable:$true] %s85_s28 }
  0x15   :  { %s3625_s6 = scalar_lea.vmem %s58_s26, 1024  ;;  %p3630_p1 = scmp.lt.s32.totalorder %s58_s26, %s58_s26 }
  0x16   :  { %p3626_p0 = scmp.ne.s32.totalorder %s58_s26, %s3625_s6  ;;  %p3631_p2 = scmp.lt.s32.totalorder %s3625_s6, %s3625_s6 }
  0x18   :  { %p3632_p3 = por %p3631_p2, %p3630_p1 }
  0x1a   :  { %p3633_p4 = pnand %p3632_p3, %p3626_p0 }
  0x1c   :  { %3636 = shalt.err (!%p3633_p4)
}
  0x1d   :  { %s3959_s2 = smov 64   ;;  %s3960_s29 = smov 4  }
  0x1e   :  { %s4602_s30 = sld [smem:[#allocation39_spill]]  ;;  %s3645_s3 = scalar_lea.vmem %s86_s28, 1024 }
  0x1f   :  { %p3646_p5 = scmp.ne.s32.totalorder %s86_s28, %s3645_s3  ;;  %p3650_p6 = scmp.lt.s32.totalorder %s86_s28, %s86_s28 }
  0x20   :  { %p3651_p7 = scmp.lt.s32.totalorder %s3645_s3, %s3645_s3 }
  0x22   :  { %p3652_p8 = por %p3651_p7, %p3650_p6 }
  0x24   :  { %63 = dma.hbm_to_vmem [thread:$0]  %s4602_s30, 1024, %s58_s26, [#allocation6], %s3959_s2, %s3959_s2, %s3960_s29  }
  0x25   :  { %p3653_p9 = pnand %p3652_p8, %p3646_p5 }
  0x27   :  { %3656 = shalt.err (!%p3653_p9)
}
  0x28   :  { %s4603_s4 = sld [smem:[#allocation43_spill]]  ;;  %s3961_s1 = smov [#allocation11]  }
  0x29   :  { %s113_s5 = sshll.u32 %s3961_s1, 4  ;;  %s3962_s27 = smov [#allocation14]   ;;  %s114_s5 = int_to_ptr.vmem [resolvable:$true] %s113_s5 }
  0x2a   :  { %s141_s6 = sshll.u32 %s3962_s27, 4  ;;  %s3665_s26 = scalar_lea.vmem %s114_s5, 1024  ;;  %s142_s6 = int_to_ptr.vmem [resolvable:$true] %s141_s6 }
  0x2b   :  { %p3666_p10 = scmp.ne.s32.totalorder %s114_s5, %s3665_s26  ;;  %p3670_p11 = scmp.lt.s32.totalorder %s114_s5, %s114_s5 }
  0x2c   :  { %p3671_p12 = scmp.lt.s32.totalorder %s3665_s26, %s3665_s26 }
  0x2e   :  { %91 = dma.hbm_to_vmem [thread:$0]  %s4603_s4, 1024, %s86_s28, [#allocation9], %s3959_s2, %s3959_s2, %s3960_s29  }
  0x2f   :  { %p3672_p13 = por %p3671_p12, %p3670_p11 }
  0x31   :  { %p3673_p0 = pnand %p3672_p13, %p3666_p10 }
  0x33   :  { %3676 = shalt.err (!%p3673_p0)
}
  0x34   :  { %119 = dma.hbm_to_vmem [thread:$0]  %s4577_s9, 1024, %s114_s5, [#allocation12], %s3959_s2, %s3959_s2, %s3960_s29  }
  0x35   :  { %s3685_s28 = scalar_lea.vmem %s142_s6, 1024  ;;  %p3690_p2 = scmp.lt.s32.totalorder %s142_s6, %s142_s6 }
  0x36   :  { %p3686_p1 = scmp.ne.s32.totalorder %s142_s6, %s3685_s28  ;;  %p3691_p3 = scmp.lt.s32.totalorder %s3685_s28, %s3685_s28 }
  0x38   :  { %p3692_p4 = por %p3691_p3, %p3690_p2 }
  0x3a   :  { %p3693_p5 = pnand %p3692_p4, %p3686_p1 }
  0x3c   :  { %3696 = shalt.err (!%p3693_p5)
}
  0x3d   :  { %147 = dma.hbm_to_vmem [thread:$0]  %s4581_s13, 1024, %s142_s6, [#allocation15], %s3959_s2, %s3959_s2, %s3960_s29  }
  0x3e   :  { %s3963_s25 = smov [#allocation2]   ;;  %s3964_s4 = smov [#allocation7]  }
  0x3f   :  { %s45_s8 = sshll.u32 %s3963_s25, 4  ;;  %s71_s1 = sshll.u32 %s3964_s4, 4  ;;  %s46_s8 = int_to_ptr.vmem [resolvable:$true] %s45_s8  ;;  %s72_s1 = int_to_ptr.vmem [resolvable:$true] %s71_s1 }
  0x40   :  { %s3705_s9 = scalar_lea.vmem %s46_s8, 1024  ;;  %p3710_p7 = scmp.lt.s32.totalorder %s46_s8, %s46_s8 }
  0x41   :  { %p3706_p6 = scmp.ne.s32.totalorder %s46_s8, %s3705_s9  ;;  %p3711_p8 = scmp.lt.s32.totalorder %s3705_s9, %s3705_s9 }
  0x43   :  { %p3712_p9 = por %p3711_p8, %p3710_p7 }
  0x45   :  { %p3713_p10 = pnand %p3712_p9, %p3706_p6 }
  0x47   :  { %3716 = shalt.err (!%p3713_p10)
}
  0x48   :  { %s4604_s26 = sld [smem:[#allocation38_spill]]  ;;  %s3725_s13 = scalar_lea.vmem %s72_s1, 1024 }
  0x49   :  { %p3726_p11 = scmp.ne.s32.totalorder %s72_s1, %s3725_s13  ;;  %p3730_p12 = scmp.lt.s32.totalorder %s72_s1, %s72_s1 }
  0x4a   :  { %p3731_p13 = scmp.lt.s32.totalorder %s3725_s13, %s3725_s13 }
  0x4c   :  { %p3732_p0 = por %p3731_p13, %p3730_p12 }
  0x4e   :  { %51 = dma.hbm_to_vmem [thread:$0]  %s4604_s26, 1024, %s46_s8, [#allocation3], %s3959_s2, %s3959_s2, %s3960_s29  }
  0x4f   :  { %p3733_p1 = pnand %p3732_p0, %p3726_p11 }
  0x51   :  { %3736 = shalt.err (!%p3733_p1)
}
  0x52   :  { %s4605_s7 = sld [smem:[#allocation41_spill]]  ;;  %s3965_s28 = smov [#allocation10]  }
  0x53   :  { %s99_s30 = sshll.u32 %s3965_s28, 4  ;;  %s3966_s3 = smov [#allocation13]   ;;  %s100_s30 = int_to_ptr.vmem [resolvable:$true] %s99_s30 }
  0x54   :  { %s127_s25 = sshll.u32 %s3966_s3, 4  ;;  %s3745_s8 = scalar_lea.vmem %s100_s30, 1024  ;;  %s128_s25 = int_to_ptr.vmem [resolvable:$true] %s127_s25 }
  0x55   :  { %p3746_p2 = scmp.ne.s32.totalorder %s100_s30, %s3745_s8  ;;  %p3750_p3 = scmp.lt.s32.totalorder %s100_s30, %s100_s30 }
  0x56   :  { %p3751_p4 = scmp.lt.s32.totalorder %s3745_s8, %s3745_s8 }
  0x58   :  { %77 = dma.hbm_to_vmem [thread:$0]  %s4605_s7, 1024, %s72_s1, [#allocation6], %s3959_s2, %s3959_s2, %s3960_s29  }
  0x59   :  { %p3752_p5 = por %p3751_p4, %p3750_p3 }
  0x5b   :  { %p3753_p6 = pnand %p3752_p5, %p3746_p2 }
  0x5d   :  { %3756 = shalt.err (!%p3753_p6)
}
  0x5e   :  { %s4606_s5 = sld [smem:[#allocation45_spill]]  ;;  %s3765_s1 = scalar_lea.vmem %s128_s25, 1024 }
  0x5f   :  { %p3766_p7 = scmp.ne.s32.totalorder %s128_s25, %s3765_s1  ;;  %p3770_p8 = scmp.lt.s32.totalorder %s128_s25, %s128_s25 }
  0x60   :  { %p3771_p9 = scmp.lt.s32.totalorder %s3765_s1, %s3765_s1 }
  0x62   :  { %p3772_p10 = por %p3771_p9, %p3770_p8 }
  0x64   :  { %105 = dma.hbm_to_vmem [thread:$0]  %s4606_s5, 1024, %s100_s30, [#allocation9], %s3959_s2, %s3959_s2, %s3960_s29  }
  0x65   :  { %p3773_p11 = pnand %p3772_p10, %p3766_p7 }
  0x67   :  { %3776 = shalt.err (!%p3773_p11)
}
  0x68   :  { %133 = dma.hbm_to_vmem [thread:$0]  %s4579_s11, 1024, %s128_s25, [#allocation12], %s3959_s2, %s3959_s2, %s3960_s29  }
  0x69   :  { %s3967_s13 = smov [#allocation16]   ;;  %s3968_s0 = smov [#allocation17]  }
  0x6a   :  { %s155_s6 = sshll.u32 %s3967_s13, 4  ;;  %s169_s7 = sshll.u32 %s3968_s0, 4  ;;  %s156_s6 = int_to_ptr.vmem [resolvable:$true] %s155_s6  ;;  %s170_s7 = int_to_ptr.vmem [resolvable:$true] %s169_s7 }
  0x6b   :  { %s3785_s28 = scalar_lea.vmem %s156_s6, 1024  ;;  %p3790_p13 = scmp.lt.s32.totalorder %s156_s6, %s156_s6 }
  0x6c   :  { %p3786_p12 = scmp.ne.s32.totalorder %s156_s6, %s3785_s28  ;;  %p3791_p0 = scmp.lt.s32.totalorder %s3785_s28, %s3785_s28 }
  0x6e   :  { %p3792_p1 = por %p3791_p0, %p3790_p13 }
  0x70   :  { %p3793_p2 = pnand %p3792_p1, %p3786_p12 }
  0x72   :  { %3796 = shalt.err (!%p3793_p2)
}
  0x73   :  { %161 = dma.hbm_to_vmem [thread:$0]  %s4583_s15, 1024, %s156_s6, [#allocation15], %s3959_s2, %s3959_s2, %s3960_s29  }
  0x74   :  { %s3805_s11 = scalar_lea.vmem %s170_s7, 1024  ;;  %p3810_p4 = scmp.lt.s32.totalorder %s170_s7, %s170_s7 }
  0x75   :  { %p3806_p3 = scmp.ne.s32.totalorder %s170_s7, %s3805_s11  ;;  %p3811_p5 = scmp.lt.s32.totalorder %s3805_s11, %s3805_s11 }
  0x77   :  { %p3812_p6 = por %p3811_p5, %p3810_p4 }
  0x79   :  { %p3813_p7 = pnand %p3812_p6, %p3806_p3 }
  0x7b   :  { %3816 = shalt.err (!%p3813_p7)
}
  0x7c   :  { %175 = dma.hbm_to_vmem [thread:$0]  %s4585_s17, 1024, %s170_s7, [#allocation18], %s3959_s2, %s3959_s2, %s3960_s29  }
  0x7d   :  { %3937 = dma.done.wait [#allocation3], 1024  }
  0x7e   :  { %3938 = vsyncadd [#allocation3], 4294966272 }
  0x7f   :  { %3939 = dma.done.wait [#allocation6], 2048  }
  0x80   :  { %3940 = vsyncadd [#allocation6], 4294965248 }
  0x81   :  { %3941 = dma.done.wait [#allocation9], 2048  }
  0x82   :  { %3942 = vsyncadd [#allocation9], 4294965248 }
  0x83   :  { %3943 = dma.done.wait [#allocation12], 2048  }
  0x84   :  { %3944 = vsyncadd [#allocation12], 4294965248 }
  0x85   :  { %3945 = dma.done.wait [#allocation15], 2048  }
  0x86   :  { %3946 = vsyncadd [#allocation15], 4294965248 }
  0x87   :  { %3947 = dma.done.wait [#allocation18], 1024  }
  0x88   :  { %3948 = vsyncadd [#allocation18], 4294966272  ;;  %v3473_v0 = vld [vmem:[#allocation5 + $0x38] sm:$0xff]   ;;  %v3474_v1 = vld [vmem:[#allocation5 + $0x30] sm:$0xff]   ;;  %s4607_s4 = sld [smem:[#allocation40_spill]]  ;;  %s3970_s17 = smov [#allocation23]  }
  0x89   :  { %3149 = vmatprep.subr.bf16.mxu0 %v3473_v0  ;;  %v3475_v2 = vld [vmem:[#allocation5 + $0x28] sm:$0xff]   ;;  %v3476_v3 = vld [vmem:[#allocation5 + $0x20] sm:$0xff]   ;;  %v3477_v5 = vld [vmem:[#allocation5 + $0x18] sm:$0xff]   ;;  %s4608_s1 = sld [smem:[#allocation42_spill]] }
  0x8a   :  { %3150 = vmatpush3.bf16.msra.mxu0 %v3473_v0  ;;  %v3481_v4 = vld [vmem:[#allocation2] sm:$0xff]   ;;  %v3478_v6 = vld [vmem:[#allocation5 + $0x10] sm:$0xff]   ;;  %v3489_v7 = vld [vmem:[#allocation7 + $0x38] sm:$0xff]   ;;  %s4609_s13 = sld [smem:[#allocation44_spill]] }
  0x8b   :  { %3151 = vmatprep.subr.bf16.mxu0 %v3474_v1  ;;  %3165 = vmatprep.mubr.bf16.mxu0 %v3481_v4  ;;  %v3490_v8 = vld [vmem:[#allocation7 + $0x30] sm:$0xff]   ;;  %v3479_v9 = vld [vmem:[#allocation5 + $0x8] sm:$0xff]   ;;  %v3480_v11 = vld [vmem:[#allocation5] sm:$0xff]   ;;  %s4610_s7 = sld [smem:[#allocation46_spill]] }
  0x8c   :  { %3181 = vmatprep.subr.bf16.mxu1 %v3489_v7  ;;  %v3491_v10 = vld [vmem:[#allocation7 + $0x28] sm:$0xff]   ;;  %v3492_v12 = vld [vmem:[#allocation7 + $0x20] sm:$0xff]   ;;  %v3493_v13 = vld [vmem:[#allocation7 + $0x18] sm:$0xff]  }
  0x8d   :  { %3182 = vmatpush3.bf16.msra.mxu1 %v3489_v7  ;;  %v3482_v14 = vld [vmem:[#allocation2 + $0x8] sm:$0xff]   ;;  %v3483_v15 = vld [vmem:[#allocation2 + $0x10] sm:$0xff]   ;;  %v3484_v16 = vld [vmem:[#allocation2 + $0x18] sm:$0xff]  }
  0x8e   :  { %3152 = vmatpush3.bf16.msra.mxu0 %v3474_v1  ;;  %3183 = vmatprep.subr.bf16.mxu1 %v3490_v8  ;;  %v3485_v17 = vld [vmem:[#allocation2 + $0x20] sm:$0xff]   ;;  %v3486_v18 = vld [vmem:[#allocation2 + $0x28] sm:$0xff]   ;;  %v3487_v19 = vld [vmem:[#allocation2 + $0x30] sm:$0xff]  }
  0x8f   :  { %3153 = vmatprep.subr.bf16.mxu0 %v3475_v2  ;;  %v3488_v20 = vld [vmem:[#allocation2 + $0x38] sm:$0xff]   ;;  %v3494_v21 = vld [vmem:[#allocation7 + $0x10] sm:$0xff]   ;;  %v3495_v22 = vld [vmem:[#allocation7 + $0x8] sm:$0xff]  }
  0x90   :  { %v3496_v23 = vld [vmem:[#allocation7] sm:$0xff]   ;;  %v3497_v24 = vld [vmem:[#allocation8 + $0x38] sm:$0xff]   ;;  %v3498_v25 = vld [vmem:[#allocation8 + $0x30] sm:$0xff]  }
  0x91   :  { %3184 = vmatpush3.bf16.msra.mxu1 %v3490_v8  ;;  %v3499_v26 = vld [vmem:[#allocation8 + $0x28] sm:$0xff]   ;;  %v3500_v27 = vld [vmem:[#allocation8 + $0x20] sm:$0xff]   ;;  %v3501_v28 = vld [vmem:[#allocation8 + $0x18] sm:$0xff]  }
  0x92   :  { %3154 = vmatpush3.bf16.msra.mxu0 %v3475_v2  ;;  %3185 = vmatprep.subr.bf16.mxu1 %v3491_v10  ;;  %v4165_v30 = vld [vmem:[%s4607_s4] ss:$0 sm:$0xff]  ;;  %s2541_s4 = sshll.u32 %s3970_s17, 4  ;;  %s2542_s4 = int_to_ptr.vmem [resolvable:$true] %s2541_s4 }
  0x93   :  { %3155 = vmatprep.subr.bf16.mxu0 %v3476_v3 }
  0x95   :  { %3186 = vmatpush3.bf16.msra.mxu1 %v3491_v10 }
  0x96   :  { %3156 = vmatpush3.bf16.msra.mxu0 %v3476_v3  ;;  %3187 = vmatprep.subr.bf16.mxu1 %v3492_v12 }
  0x97   :  { %3157 = vmatprep.subr.bf16.mxu0 %v3477_v5 }
  0x99   :  { %3188 = vmatpush3.bf16.msra.mxu1 %v3492_v12 }
  0x9a   :  { %3158 = vmatpush3.bf16.msra.mxu0 %v3477_v5  ;;  %3189 = vmatprep.subr.bf16.mxu1 %v3493_v13 }
  0x9b   :  { %3159 = vmatprep.subr.bf16.mxu0 %v3478_v6 }
  0x9d   :  { %3190 = vmatpush3.bf16.msra.mxu1 %v3493_v13 }
  0x9e   :  { %3160 = vmatpush3.bf16.msra.mxu0 %v3478_v6  ;;  %3191 = vmatprep.subr.bf16.mxu1 %v3494_v21 }
  0x9f   :  { %3161 = vmatprep.subr.bf16.mxu0 %v3479_v9 }
  0xa1   :  { %3192 = vmatpush3.bf16.msra.mxu1 %v3494_v21 }
  0xa2   :  { %3162 = vmatpush3.bf16.msra.mxu0 %v3479_v9  ;;  %3193 = vmatprep.subr.bf16.mxu1 %v3495_v22 }
  0xa3   :  { %3163 = vmatprep.subr.bf16.mxu0 %v3480_v11 }
  0xa5   :  { %3194 = vmatpush3.bf16.msra.mxu1 %v3495_v22  ;;  %v3502_v22 = vld [vmem:[#allocation8 + $0x10] sm:$0xff]  }
  0xa6   :  { %3164 = vmatpush3.bf16.msra.mxu0 %v3480_v11  ;;  %3195 = vmatprep.subr.bf16.mxu1 %v3496_v23 }
  0xa7   :  { %3213 = vmatprep.subr.bf16.mxu0 %v3497_v24 }
  0xa9   :  { %3166 = vmatmul.mubr.bf16.vlgmr.msra.gmra.mxu0 %v3482_v14  ;;  %3196 = vmatpush3.bf16.msra.mxu1 %v3496_v23  ;;  %v3503_v23 = vld [vmem:[#allocation8 + $0x8] sm:$0xff]  }
  0xaa   :  { %3169 = vmatprep.mubr.bf16.mxu0 %v3483_v15  ;;  %3214 = vmatpush3.bf16.msra.mxu0 %v3497_v24  ;;  %v3504_v24 = vld [vmem:[#allocation8] sm:$0xff]  }
  0xab   :  { %3215 = vmatprep.subr.bf16.mxu0 %v3498_v25 }
  0xae   :  { %3216 = vmatpush3.bf16.msra.mxu0 %v3498_v25  ;;  %v3505_v25 = vld [vmem:[#allocation10 + $0x38] sm:$0xff]  }
  0xaf   :  { %3217 = vmatprep.subr.bf16.mxu0 %v3499_v26  ;;  %3245 = vmatprep.subr.bf16.mxu1 %v3505_v25 }
  0xb1   :  { %3170 = vmatmul.mubr.bf16.gmra.mxu0 %v3484_v16 }
  0xb2   :  { %3173 = vmatprep.mubr.bf16.mxu0 %v3485_v17  ;;  %3218 = vmatpush3.bf16.msra.mxu0 %v3499_v26  ;;  %v3506_v26 = vld [vmem:[#allocation10 + $0x30] sm:$0xff]  }
  0xb3   :  { %3219 = vmatprep.subr.bf16.mxu0 %v3500_v27 }
  0xb6   :  { %3220 = vmatpush3.bf16.msra.mxu0 %v3500_v27  ;;  %v3507_v27 = vld [vmem:[#allocation10 + $0x28] sm:$0xff]  }
  0xb7   :  { %3221 = vmatprep.subr.bf16.mxu0 %v3501_v28 }
  0xb9   :  { %3174 = vmatmul.mubr.bf16.gmra.mxu0 %v3486_v18 }
  0xba   :  { %3177 = vmatprep.mubr.bf16.mxu0 %v3487_v19  ;;  %3222 = vmatpush3.bf16.msra.mxu0 %v3501_v28  ;;  %v3508_v28 = vld [vmem:[#allocation10 + $0x20] sm:$0xff]  }
  0xbb   :  { %3223 = vmatprep.subr.bf16.mxu0 %v3502_v22 }
  0xbe   :  { %3224 = vmatpush3.bf16.msra.mxu0 %v3502_v22 }
  0xbf   :  { %3225 = vmatprep.subr.bf16.mxu0 %v3503_v23 }
  0xc1   :  { %3178 = vmatmul.mubr.bf16.gmra.mxu0 %v3488_v20 }
  0xc2   :  { %3226 = vmatpush3.bf16.msra.mxu0 %v3503_v23  ;;  %v3510_v23 = vld [vmem:[#allocation10 + $0x10] sm:$0xff]  }
  0xc3   :  { %3227 = vmatprep.subr.bf16.mxu0 %v3504_v24 }
  0xc6   :  { %3228 = vmatpush3.bf16.msra.mxu0 %v3504_v24  ;;  %v3511_v24 = vld [vmem:[#allocation10 + $0x8] sm:$0xff]  }
 0x169   :  { %v3167_v29 = vpop.f32.mrf.mxu0 }
 0x16a   :  { %v387_v32 = vadd.f32 %v3167_v29, %v4165_v30  ;;  %v3509_v29 = vld [vmem:[#allocation10 + $0x18] sm:$0xff]  }
 0x16b   :  { %v378_v31 = vpop.f32.mrf.mxu0 }
 0x16c   :  { %v379_v34 = vadd.f32 %v4165_v30, %v378_v31  ;;  %v443_v37 = vmax.f32 %v387_v32, 0.0  ;;  %v4186_v31 = vld [vmem:[%s4608_s1] ss:$0 sm:$0xff] }
 0x16d   :  { %v3168_v33 = vpop.f32.mrf.mxu0 }
 0x16e   :  { %v390_v35 = vadd.f32 %v3168_v33, %v4165_v30  ;;  %v441_v41 = vmax.f32 %v379_v34, 0.0 }
 0x16f   :  { %v381_v36 = vpop.f32.mrf.mxu0 }
 0x170   :  { %v444_v38 = vmax.f32 %v390_v35, 0.0  ;;  %v382_v39 = vadd.f32 %v4165_v30, %v381_v36 }
 0x171   :  { %v3171_v40 = vpop.f32.mrf.mxu0 }
 0x172   :  { %v458_v42 = vpack.c.bf16 %v444_v38, %v443_v37  ;;  %v442_v43 = vmax.f32 %v382_v39, 0.0  ;;  %v403_v45 = vadd.f32 %v3171_v40, %v4165_v30 }
 0x173   :  { %v394_v44 = vpop.f32.mrf.mxu0 }
 0x174   :  { %2977 = vst [vmem:[#allocation20 + $0x8] sm:$0xff] %v458_v42   ;;  %v457_v46 = vpack.c.bf16 %v442_v43, %v441_v41  ;;  %v395_v48 = vadd.f32 %v4165_v30, %v394_v44  ;;  %v447_v51 = vmax.f32 %v403_v45, 0.0 }
 0x175   :  { %v3172_v47 = vpop.f32.mrf.mxu0 }
 0x176   :  { %v406_v49 = vadd.f32 %v3172_v47, %v4165_v30  ;;  %3197 = vmatprep.mubr.bf16.mxu1 %v457_v46  ;;  %2821 = vst [vmem:[#allocation20] sm:$0xff] %v457_v46   ;;  %v445_v55 = vmax.f32 %v395_v48, 0.0 }
 0x177   :  { %v397_v50 = vpop.f32.mrf.mxu0  ;;  %3198 = vmatmul.mubr.bf16.vlgmr.msra.gmra.mxu1 %v458_v42 }
 0x178   :  { %v448_v52 = vmax.f32 %v406_v49, 0.0  ;;  %v398_v53 = vadd.f32 %v4165_v30, %v397_v50  ;;  %3246 = vmatpush3.bf16.msra.mxu1 %v3505_v25  ;;  %v3512_v25 = vld [vmem:[#allocation10] sm:$0xff]  }
 0x179   :  { %v3175_v54 = vpop.f32.mrf.mxu0  ;;  %3247 = vmatprep.subr.bf16.mxu1 %v3506_v26 }
 0x17a   :  { %v460_v56 = vpack.c.bf16 %v448_v52, %v447_v51  ;;  %v446_v57 = vmax.f32 %v398_v53, 0.0  ;;  %v419_v60 = vadd.f32 %v3175_v54, %v4165_v30 }
 0x17b   :  { %v410_v58 = vpop.f32.mrf.mxu0 }
 0x17c   :  { %2979 = vst [vmem:[#allocation20 + $0x18] sm:$0xff] %v460_v56   ;;  %v459_v59 = vpack.c.bf16 %v446_v57, %v445_v55  ;;  %v411_v62 = vadd.f32 %v4165_v30, %v410_v58  ;;  %v451_v1 = vmax.f32 %v419_v60, 0.0  ;;  %3248 = vmatpush3.bf16.msra.mxu1 %v3506_v26  ;;  %v3513_v26 = vld [vmem:[#allocation11 + $0x38] sm:$0xff]  }
 0x17d   :  { %v3176_v61 = vpop.f32.mrf.mxu0  ;;  %3249 = vmatprep.subr.bf16.mxu1 %v3507_v27  ;;  %3277 = vmatprep.subr.bf16.mxu0 %v3513_v26 }
 0x17e   :  { %2978 = vst [vmem:[#allocation20 + $0x10] sm:$0xff] %v459_v59   ;;  %v422_v63 = vadd.f32 %v3176_v61, %v4165_v30  ;;  %3201 = vmatprep.mubr.bf16.mxu1 %v459_v59  ;;  %v449_v5 = vmax.f32 %v411_v62, 0.0 }
 0x17f   :  { %v413_v0 = vpop.f32.mrf.mxu0  ;;  %3202 = vmatmul.mubr.bf16.gmra.mxu1 %v460_v56 }
 0x180   :  { %v452_v2 = vmax.f32 %v422_v63, 0.0  ;;  %v414_v3 = vadd.f32 %v4165_v30, %v413_v0  ;;  %3250 = vmatpush3.bf16.msra.mxu1 %v3507_v27  ;;  %v3514_v27 = vld [vmem:[#allocation11 + $0x30] sm:$0xff]  }
 0x181   :  { %v3179_v4 = vpop.f32.mrf.mxu0  ;;  %3251 = vmatprep.subr.bf16.mxu1 %v3508_v28 }
 0x182   :  { %v462_v6 = vpack.c.bf16 %v452_v2, %v451_v1  ;;  %v450_v7 = vmax.f32 %v414_v3, 0.0  ;;  %v435_v10 = vadd.f32 %v3179_v4, %v4165_v30 }
 0x183   :  { %v426_v8 = vpop.f32.mrf.mxu0 }
 0x184   :  { %2981 = vst [vmem:[#allocation20 + $0x28] sm:$0xff] %v462_v6   ;;  %v461_v9 = vpack.c.bf16 %v450_v7, %v449_v5  ;;  %v427_v12 = vadd.f32 %v4165_v30, %v426_v8  ;;  %v455_v15 = vmax.f32 %v435_v10, 0.0  ;;  %3252 = vmatpush3.bf16.msra.mxu1 %v3508_v28  ;;  %v3515_v28 = vld [vmem:[#allocation11 + $0x28] sm:$0xff]  }
 0x185   :  { %v3180_v11 = vpop.f32.mrf.mxu0  ;;  %3253 = vmatprep.subr.bf16.mxu1 %v3509_v29 }
 0x186   :  { %2980 = vst [vmem:[#allocation20 + $0x20] sm:$0xff] %v461_v9   ;;  %v438_v13 = vadd.f32 %v3180_v11, %v4165_v30  ;;  %3205 = vmatprep.mubr.bf16.mxu1 %v461_v9  ;;  %v453_v18 = vmax.f32 %v427_v12, 0.0 }
 0x187   :  { %v429_v14 = vpop.f32.mrf.mxu0  ;;  %3206 = vmatmul.mubr.bf16.gmra.mxu1 %v462_v6 }
 0x188   :  { %v456_v16 = vmax.f32 %v438_v13, 0.0  ;;  %v430_v17 = vadd.f32 %v4165_v30, %v429_v14  ;;  %3254 = vmatpush3.bf16.msra.mxu1 %v3509_v29  ;;  %v3516_v29 = vld [vmem:[#allocation11 + $0x20] sm:$0xff]  }
 0x189   :  { %3255 = vmatprep.subr.bf16.mxu1 %v3510_v23 }
 0x18a   :  { %v464_v19 = vpack.c.bf16 %v456_v16, %v455_v15  ;;  %v454_v20 = vmax.f32 %v430_v17, 0.0 }
 0x18c   :  { %2983 = vst [vmem:[#allocation20 + $0x38] sm:$0xff] %v464_v19   ;;  %v463_v21 = vpack.c.bf16 %v454_v20, %v453_v18  ;;  %3256 = vmatpush3.bf16.msra.mxu1 %v3510_v23 }
 0x18d   :  { %3257 = vmatprep.subr.bf16.mxu1 %v3511_v24 }
 0x18e   :  { %2982 = vst [vmem:[#allocation20 + $0x30] sm:$0xff] %v463_v21   ;;  %3209 = vmatprep.mubr.bf16.mxu1 %v463_v21 }
 0x18f   :  { %3210 = vmatmul.mubr.bf16.gmra.mxu1 %v464_v19 }
 0x190   :  { %3258 = vmatpush3.bf16.msra.mxu1 %v3511_v24 }
 0x191   :  { %3259 = vmatprep.subr.bf16.mxu1 %v3512_v25 }
 0x194   :  { %3260 = vmatpush3.bf16.msra.mxu1 %v3512_v25  ;;  %v3519_v25 = vld [vmem:[#allocation11 + $0x8] sm:$0xff]  }
 0x237   :  { %v3199_v30 = vpop.f32.mrf.mxu1 }
 0x238   :  { %v579_v33 = vadd.f32 %v3199_v30, %v4186_v31  ;;  %v3517_v30 = vld [vmem:[#allocation11 + $0x18] sm:$0xff]  }
 0x239   :  { %v570_v32 = vpop.f32.mrf.mxu1 }
 0x23a   :  { %v571_v35 = vadd.f32 %v4186_v31, %v570_v32  ;;  %v635_v38 = vmax.f32 %v579_v33, 0.0  ;;  %v4207_v33 = vld [vmem:[%s4609_s13] ss:$0 sm:$0xff] }
 0x23b   :  { %v3200_v34 = vpop.f32.mrf.mxu1 }
 0x23c   :  { %v582_v36 = vadd.f32 %v3200_v34, %v4186_v31  ;;  %v633_v42 = vmax.f32 %v571_v35, 0.0 }
 0x23d   :  { %v573_v37 = vpop.f32.mrf.mxu1 }
 0x23e   :  { %v636_v39 = vmax.f32 %v582_v36, 0.0  ;;  %v574_v40 = vadd.f32 %v4186_v31, %v573_v37 }
 0x23f   :  { %v3203_v41 = vpop.f32.mrf.mxu1 }
 0x240   :  { %v650_v43 = vpack.c.bf16 %v636_v39, %v635_v38  ;;  %v634_v44 = vmax.f32 %v574_v40, 0.0  ;;  %v595_v47 = vadd.f32 %v3203_v41, %v4186_v31 }
 0x241   :  { %v586_v45 = vpop.f32.mrf.mxu1 }
 0x242   :  { %2984 = vst [vmem:[#allocation22 + $0x8] sm:$0xff] %v650_v43   ;;  %v649_v46 = vpack.c.bf16 %v634_v44, %v633_v42  ;;  %v587_v49 = vadd.f32 %v4186_v31, %v586_v45  ;;  %v639_v52 = vmax.f32 %v595_v47, 0.0 }
 0x243   :  { %v3204_v48 = vpop.f32.mrf.mxu1 }
 0x244   :  { %2861 = vst [vmem:[#allocation22] sm:$0xff] %v649_v46   ;;  %v598_v50 = vadd.f32 %v3204_v48, %v4186_v31  ;;  %3229 = vmatprep.mubr.bf16.mxu0 %v649_v46  ;;  %v637_v56 = vmax.f32 %v587_v49, 0.0 }
 0x245   :  { %v589_v51 = vpop.f32.mrf.mxu1  ;;  %3230 = vmatmul.mubr.bf16.vlgmr.msra.gmra.mxu0 %v650_v43 }
 0x246   :  { %v640_v53 = vmax.f32 %v598_v50, 0.0  ;;  %v590_v54 = vadd.f32 %v4186_v31, %v589_v51  ;;  %3278 = vmatpush3.bf16.msra.mxu0 %v3513_v26  ;;  %v3520_v26 = vld [vmem:[#allocation11] sm:$0xff]  }
 0x247   :  { %v3207_v55 = vpop.f32.mrf.mxu1  ;;  %3279 = vmatprep.subr.bf16.mxu0 %v3514_v27 }
 0x248   :  { %v652_v57 = vpack.c.bf16 %v640_v53, %v639_v52  ;;  %v638_v58 = vmax.f32 %v590_v54, 0.0  ;;  %v611_v61 = vadd.f32 %v3207_v55, %v4186_v31 }
 0x249   :  { %v602_v59 = vpop.f32.mrf.mxu1 }
 0x24a   :  { %2986 = vst [vmem:[#allocation22 + $0x18] sm:$0xff] %v652_v57   ;;  %v651_v60 = vpack.c.bf16 %v638_v58, %v637_v56  ;;  %v603_v63 = vadd.f32 %v4186_v31, %v602_v59  ;;  %v643_v2 = vmax.f32 %v611_v61, 0.0  ;;  %3280 = vmatpush3.bf16.msra.mxu0 %v3514_v27  ;;  %v4228_v27 = vld [vmem:[%s4610_s7] ss:$0 sm:$0xff] }
 0x24b   :  { %v3208_v62 = vpop.f32.mrf.mxu1  ;;  %3281 = vmatprep.subr.bf16.mxu0 %v3515_v28 }
 0x24c   :  { %2985 = vst [vmem:[#allocation22 + $0x10] sm:$0xff] %v651_v60   ;;  %v614_v0 = vadd.f32 %v3208_v62, %v4186_v31  ;;  %3233 = vmatprep.mubr.bf16.mxu0 %v651_v60  ;;  %v641_v6 = vmax.f32 %v603_v63, 0.0 }
 0x24d   :  { %v605_v1 = vpop.f32.mrf.mxu1  ;;  %3234 = vmatmul.mubr.bf16.gmra.mxu0 %v652_v57 }
 0x24e   :  { %v644_v3 = vmax.f32 %v614_v0, 0.0  ;;  %v606_v4 = vadd.f32 %v4186_v31, %v605_v1  ;;  %3282 = vmatpush3.bf16.msra.mxu0 %v3515_v28 }
 0x24f   :  { %v3211_v5 = vpop.f32.mrf.mxu1  ;;  %3283 = vmatprep.subr.bf16.mxu0 %v3516_v29 }
 0x250   :  { %v654_v7 = vpack.c.bf16 %v644_v3, %v643_v2  ;;  %v642_v8 = vmax.f32 %v606_v4, 0.0  ;;  %v627_v11 = vadd.f32 %v3211_v5, %v4186_v31 }
 0x251   :  { %v618_v9 = vpop.f32.mrf.mxu1 }
 0x252   :  { %2988 = vst [vmem:[#allocation22 + $0x28] sm:$0xff] %v654_v7   ;;  %v653_v10 = vpack.c.bf16 %v642_v8, %v641_v6  ;;  %v619_v13 = vadd.f32 %v4186_v31, %v618_v9  ;;  %v647_v16 = vmax.f32 %v627_v11, 0.0  ;;  %3284 = vmatpush3.bf16.msra.mxu0 %v3516_v29 }
 0x253   :  { %v3212_v12 = vpop.f32.mrf.mxu1  ;;  %3285 = vmatprep.subr.bf16.mxu0 %v3517_v30 }
 0x254   :  { %2987 = vst [vmem:[#allocation22 + $0x20] sm:$0xff] %v653_v10   ;;  %v630_v14 = vadd.f32 %v3212_v12, %v4186_v31  ;;  %3237 = vmatprep.mubr.bf16.mxu0 %v653_v10  ;;  %v645_v19 = vmax.f32 %v619_v13, 0.0 }
 0x255   :  { %v621_v15 = vpop.f32.mrf.mxu1  ;;  %3238 = vmatmul.mubr.bf16.gmra.mxu0 %v654_v7 }
 0x256   :  { %v648_v17 = vmax.f32 %v630_v14, 0.0  ;;  %v622_v18 = vadd.f32 %v4186_v31, %v621_v15  ;;  %v3518_v31 = vld [vmem:[#allocation11 + $0x10] sm:$0xff]   ;;  %3286 = vmatpush3.bf16.msra.mxu0 %v3517_v30 }
 0x257   :  { %3287 = vmatprep.subr.bf16.mxu0 %v3518_v31 }
 0x258   :  { %v656_v20 = vpack.c.bf16 %v648_v17, %v647_v16  ;;  %v646_v21 = vmax.f32 %v622_v18, 0.0 }
 0x25a   :  { %2990 = vst [vmem:[#allocation22 + $0x38] sm:$0xff] %v656_v20   ;;  %v655_v22 = vpack.c.bf16 %v646_v21, %v645_v19  ;;  %3288 = vmatpush3.bf16.msra.mxu0 %v3518_v31 }
 0x25b   :  { %3289 = vmatprep.subr.bf16.mxu0 %v3519_v25 }
 0x25c   :  { %2989 = vst [vmem:[#allocation22 + $0x30] sm:$0xff] %v655_v22   ;;  %3241 = vmatprep.mubr.bf16.mxu0 %v655_v22 }
 0x25d   :  { %3242 = vmatmul.mubr.bf16.gmra.mxu0 %v656_v20 }
 0x25e   :  { %3290 = vmatpush3.bf16.msra.mxu0 %v3519_v25  ;;  %v3526_v25 = vld [vmem:[#allocation13 + $0x10] sm:$0xff]  }
 0x25f   :  { %3291 = vmatprep.subr.bf16.mxu0 %v3520_v26 }
 0x262   :  { %3292 = vmatpush3.bf16.msra.mxu0 %v3520_v26  ;;  %v3527_v26 = vld [vmem:[#allocation13 + $0x8] sm:$0xff]  }
 0x305   :  { %v3231_v32 = vpop.f32.mrf.mxu0 }
 0x306   :  { %v771_v35 = vadd.f32 %v3231_v32, %v4207_v33 }
 0x307   :  { %v762_v34 = vpop.f32.mrf.mxu0 }
 0x308   :  { %v763_v37 = vadd.f32 %v4207_v33, %v762_v34  ;;  %v827_v40 = vmax.f32 %v771_v35, 0.0 }
 0x309   :  { %v3232_v36 = vpop.f32.mrf.mxu0 }
 0x30a   :  { %v774_v38 = vadd.f32 %v3232_v36, %v4207_v33  ;;  %v825_v44 = vmax.f32 %v763_v37, 0.0 }
 0x30b   :  { %v765_v39 = vpop.f32.mrf.mxu0 }
 0x30c   :  { %v828_v41 = vmax.f32 %v774_v38, 0.0  ;;  %v766_v42 = vadd.f32 %v4207_v33, %v765_v39 }
 0x30d   :  { %v3235_v43 = vpop.f32.mrf.mxu0 }
 0x30e   :  { %v842_v45 = vpack.c.bf16 %v828_v41, %v827_v40  ;;  %v826_v46 = vmax.f32 %v766_v42, 0.0  ;;  %v787_v49 = vadd.f32 %v3235_v43, %v4207_v33 }
 0x30f   :  { %v778_v47 = vpop.f32.mrf.mxu0 }
 0x310   :  { %2991 = vst [vmem:[#allocation23 + $0x8] sm:$0xff] %v842_v45   ;;  %v841_v48 = vpack.c.bf16 %v826_v46, %v825_v44  ;;  %v779_v51 = vadd.f32 %v4207_v33, %v778_v47  ;;  %v831_v54 = vmax.f32 %v787_v49, 0.0 }
 0x311   :  { %v3236_v50 = vpop.f32.mrf.mxu0 }
 0x312   :  { %2901 = vst [vmem:[#allocation23] sm:$0xff] %v841_v48   ;;  %v790_v52 = vadd.f32 %v3236_v50, %v4207_v33  ;;  %3261 = vmatprep.mubr.bf16.mxu1 %v841_v48  ;;  %v829_v58 = vmax.f32 %v779_v51, 0.0 }
 0x313   :  { %v781_v53 = vpop.f32.mrf.mxu0  ;;  %3262 = vmatmul.mubr.bf16.vlgmr.msra.gmra.mxu1 %v842_v45 }
 0x314   :  { %v832_v55 = vmax.f32 %v790_v52, 0.0  ;;  %v782_v56 = vadd.f32 %v4207_v33, %v781_v53 }
 0x315   :  { %v3239_v57 = vpop.f32.mrf.mxu0 }
 0x316   :  { %v844_v59 = vpack.c.bf16 %v832_v55, %v831_v54  ;;  %v830_v60 = vmax.f32 %v782_v56, 0.0  ;;  %v803_v63 = vadd.f32 %v3239_v57, %v4207_v33 }
 0x317   :  { %v794_v61 = vpop.f32.mrf.mxu0 }
 0x318   :  { %2993 = vst [vmem:[#allocation23 + $0x18] sm:$0xff] %v844_v59   ;;  %v843_v62 = vpack.c.bf16 %v830_v60, %v829_v58  ;;  %v795_v1 = vadd.f32 %v4207_v33, %v794_v61  ;;  %v835_v4 = vmax.f32 %v803_v63, 0.0 }
 0x319   :  { %v3240_v0 = vpop.f32.mrf.mxu0 }
 0x31a   :  { %2992 = vst [vmem:[#allocation23 + $0x10] sm:$0xff] %v843_v62   ;;  %v806_v2 = vadd.f32 %v3240_v0, %v4207_v33  ;;  %3265 = vmatprep.mubr.bf16.mxu1 %v843_v62  ;;  %v833_v8 = vmax.f32 %v795_v1, 0.0 }
 0x31b   :  { %v797_v3 = vpop.f32.mrf.mxu0  ;;  %3266 = vmatmul.mubr.bf16.gmra.mxu1 %v844_v59 }
 0x31c   :  { %v836_v5 = vmax.f32 %v806_v2, 0.0  ;;  %v798_v6 = vadd.f32 %v4207_v33, %v797_v3 }
 0x31d   :  { %v3243_v7 = vpop.f32.mrf.mxu0 }
 0x31e   :  { %v846_v9 = vpack.c.bf16 %v836_v5, %v835_v4  ;;  %v834_v10 = vmax.f32 %v798_v6, 0.0  ;;  %v819_v13 = vadd.f32 %v3243_v7, %v4207_v33 }
 0x31f   :  { %v810_v11 = vpop.f32.mrf.mxu0 }
 0x320   :  { %2995 = vst [vmem:[#allocation23 + $0x28] sm:$0xff] %v846_v9   ;;  %v845_v12 = vpack.c.bf16 %v834_v10, %v833_v8  ;;  %v811_v15 = vadd.f32 %v4207_v33, %v810_v11  ;;  %v839_v18 = vmax.f32 %v819_v13, 0.0 }
 0x321   :  { %v3244_v14 = vpop.f32.mrf.mxu0 }
 0x322   :  { %2994 = vst [vmem:[#allocation23 + $0x20] sm:$0xff] %v845_v12   ;;  %v822_v16 = vadd.f32 %v3244_v14, %v4207_v33  ;;  %3269 = vmatprep.mubr.bf16.mxu1 %v845_v12  ;;  %v837_v21 = vmax.f32 %v811_v15, 0.0 }
 0x323   :  { %v813_v17 = vpop.f32.mrf.mxu0  ;;  %3270 = vmatmul.mubr.bf16.gmra.mxu1 %v846_v9 }
 0x324   :  { %v840_v19 = vmax.f32 %v822_v16, 0.0  ;;  %v814_v20 = vadd.f32 %v4207_v33, %v813_v17 }
 0x326   :  { %v848_v22 = vpack.c.bf16 %v840_v19, %v839_v18  ;;  %v838_v23 = vmax.f32 %v814_v20, 0.0  ;;  %v3521_v20 = vld [vmem:[#allocation13 + $0x38] sm:$0xff]  }
 0x327   :  { %3309 = vmatprep.subr.bf16.mxu1 %v3521_v20 }
 0x328   :  { %2997 = vst [vmem:[#allocation23 + $0x38] sm:$0xff] %v848_v22   ;;  %v847_v24 = vpack.c.bf16 %v838_v23, %v837_v21  ;;  %v3522_v21 = vld [vmem:[#allocation13 + $0x30] sm:$0xff]   ;;  %3310 = vmatpush3.bf16.msra.mxu1 %v3521_v20  ;;  %v3524_v23 = vld [vmem:[#allocation13 + $0x20] sm:$0xff]  }
 0x329   :  { %3311 = vmatprep.subr.bf16.mxu1 %v3522_v21 }
 0x32a   :  { %2996 = vst [vmem:[#allocation23 + $0x30] sm:$0xff] %v847_v24   ;;  %3273 = vmatprep.mubr.bf16.mxu1 %v847_v24  ;;  %v3525_v24 = vld [vmem:[#allocation13 + $0x18] sm:$0xff]  }
 0x32b   :  { %3274 = vmatmul.mubr.bf16.gmra.mxu1 %v848_v22  ;;  %v3523_v22 = vld [vmem:[#allocation13 + $0x28] sm:$0xff]  }
 0x32c   :  { %3312 = vmatpush3.bf16.msra.mxu1 %v3522_v21 }
 0x32d   :  { %3313 = vmatprep.subr.bf16.mxu1 %v3523_v22 }
 0x330   :  { %3314 = vmatpush3.bf16.msra.mxu1 %v3523_v22 }
 0x331   :  { %3315 = vmatprep.subr.bf16.mxu1 %v3524_v23 }
 0x334   :  { %3316 = vmatpush3.bf16.msra.mxu1 %v3524_v23 }
 0x335   :  { %3317 = vmatprep.subr.bf16.mxu1 %v3525_v24 }
 0x338   :  { %3318 = vmatpush3.bf16.msra.mxu1 %v3525_v24 }
 0x339   :  { %3319 = vmatprep.subr.bf16.mxu1 %v3526_v25 }
 0x33c   :  { %3320 = vmatpush3.bf16.msra.mxu1 %v3526_v25 }
 0x33d   :  { %3321 = vmatprep.subr.bf16.mxu1 %v3527_v26 }
 0x340   :  { %3322 = vmatpush3.bf16.msra.mxu1 %v3527_v26 }
 0x3d3   :  { %v3263_v28 = vpop.f32.mrf.mxu1 }
 0x3d4   :  { %v963_v29 = vadd.f32 %v3263_v28, %v4228_v27  ;;  %v3529_v28 = vld [vmem:[#allocation14 + $0x38] sm:$0xff]  }
 0x3d5   :  { %v954_v30 = vpop.f32.mrf.mxu1  ;;  %3341 = vmatprep.subr.bf16.mxu0 %v3529_v28 }
 0x3d6   :  { %v955_v31 = vadd.f32 %v4228_v27, %v954_v30  ;;  %v2236_v32 = vmul.f32 %v963_v29, %v963_v29  ;;  %v3531_v30 = vld [vmem:[#allocation14 + $0x28] sm:$0xff]  }
 0x3d7   :  { %v3264_v33 = vpop.f32.mrf.mxu1 }
 0x3d8   :  { %v966_v34 = vadd.f32 %v3264_v33, %v4228_v27  ;;  %2254 = vadd.xlane.f32.xlu1 %v2236_v32  ;;  %v2234_v35 = vmul.f32 %v955_v31, %v955_v31  ;;  %v3533_v32 = vld [vmem:[#allocation14 + $0x18] sm:$0xff]  }
 0x3d9   :  { %v957_v36 = vpop.f32.mrf.mxu1 }
 0x3da   :  { %v4233_v37 = vpack.c.bf16 %v966_v34, %v963_v29  ;;  %v958_v38 = vadd.f32 %v4228_v27, %v957_v36  ;;  %2250 = vadd.xlane.f32.xlu0 %v2234_v35  ;;  %v2237_v39 = vmul.f32 %v966_v34, %v966_v34  ;;  %v3530_v29 = vld [vmem:[#allocation14 + $0x30] sm:$0xff]   ;;  %v2708_v35 = vld [vmem:[%s4578_s10] ss:$0 sm:$0xff] }
 0x3db   :  { %v3267_v40 = vpop.f32.mrf.mxu1 }
 0x3dc   :  { %2998 = vst [vmem:[#allocation25 + $0x8] sm:$0xff] %v4233_v37   ;;  %v4237_v41 = vpack.c.bf16 %v958_v38, %v955_v31  ;;  %v979_v42 = vadd.f32 %v3267_v40, %v4228_v27  ;;  %2256 = vadd.xlane.f32.xlu1 %v2237_v39  ;;  %v2235_v43 = vmul.f32 %v958_v38, %v958_v38  ;;  %v3532_v31 = vld [vmem:[#allocation14 + $0x20] sm:$0xff]  }
 0x3dd   :  { %v970_v44 = vpop.f32.mrf.mxu1 }
 0x3de   :  { %2941 = vst [vmem:[#allocation25] sm:$0xff] %v4237_v41   ;;  %2252 = vadd.xlane.f32.xlu0 %v2235_v43  ;;  %3293 = vmatprep.mubr.bf16.mxu0 %v4237_v41  ;;  %v971_v46 = vadd.f32 %v4228_v27, %v970_v44  ;;  %v2240_v48 = vmul.f32 %v979_v42, %v979_v42 }
 0x3df   :  { %v3268_v45 = vpop.f32.mrf.mxu1  ;;  %3294 = vmatmul.mubr.bf16.vlgmr.msra.gmra.mxu0 %v4233_v37 }
 0x3e0   :  { %v982_v47 = vadd.f32 %v3268_v45, %v4228_v27  ;;  %v2238_v56 = vmul.f32 %v971_v46, %v971_v46  ;;  %3342 = vmatpush3.bf16.msra.mxu0 %v3529_v28 }
 0x3e1   :  { %v973_v49 = vpop.f32.mrf.mxu1  ;;  %3343 = vmatprep.subr.bf16.mxu0 %v3530_v29 }
 0x3e2   :  { %v4245_v50 = vpack.c.bf16 %v982_v47, %v979_v42  ;;  %v974_v51 = vadd.f32 %v4228_v27, %v973_v49  ;;  %2262 = vadd.xlane.f32.xlu0 %v2240_v48  ;;  %v2241_v52 = vmul.f32 %v982_v47, %v982_v47 }
 0x3e3   :  { %v3271_v53 = vpop.f32.mrf.mxu1 }
 0x3e4   :  { %3000 = vst [vmem:[#allocation25 + $0x18] sm:$0xff] %v4245_v50   ;;  %v4249_v54 = vpack.c.bf16 %v974_v51, %v971_v46  ;;  %v995_v55 = vadd.f32 %v3271_v53, %v4228_v27  ;;  %2264 = vadd.xlane.f32.xlu1 %v2241_v52  ;;  %v2239_v58 = vmul.f32 %v974_v51, %v974_v51 }
 0x3e5   :  { %v986_v57 = vpop.f32.mrf.mxu1  ;;  %3344 = vmatpush3.bf16.msra.mxu0 %v3530_v29 }
 0x3e6   :  { %2999 = vst [vmem:[#allocation25 + $0x10] sm:$0xff] %v4249_v54   ;;  %2258 = vadd.xlane.f32.xlu0 %v2238_v56  ;;  %3297 = vmatprep.mubr.bf16.mxu0 %v4249_v54  ;;  %v987_v60 = vadd.f32 %v4228_v27, %v986_v57  ;;  %v2244_v62 = vmul.f32 %v995_v55, %v995_v55 }
 0x3e7   :  { %v3272_v59 = vpop.f32.mrf.mxu1  ;;  %3298 = vmatmul.mubr.bf16.gmra.mxu0 %v4245_v50  ;;  %3345 = vmatprep.subr.bf16.mxu0 %v3531_v30 }
 0x3e8   :  { %v998_v61 = vadd.f32 %v3272_v59, %v4228_v27  ;;  %2260 = vadd.xlane.f32.xlu1 %v2239_v58  ;;  %v2242_v5 = vmul.f32 %v987_v60, %v987_v60 }
 0x3e9   :  { %v989_v63 = vpop.f32.mrf.mxu1  ;;  %3346 = vmatpush3.bf16.msra.mxu0 %v3531_v30 }
 0x3ea   :  { %v4257_v0 = vpack.c.bf16 %v998_v61, %v995_v55  ;;  %v990_v1 = vadd.f32 %v4228_v27, %v989_v63  ;;  %2270 = vadd.xlane.f32.xlu0 %v2244_v62  ;;  %v2245_v2 = vmul.f32 %v998_v61, %v998_v61  ;;  %3347 = vmatprep.subr.bf16.mxu0 %v3532_v31 }
 0x3eb   :  { %v3275_v3 = vpop.f32.mrf.mxu1 }
 0x3ec   :  { %3002 = vst [vmem:[#allocation25 + $0x28] sm:$0xff] %v4257_v0   ;;  %v4261_v4 = vpack.c.bf16 %v990_v1, %v987_v60  ;;  %2272 = vadd.xlane.f32.xlu1 %v2245_v2  ;;  %v2243_v8 = vmul.f32 %v990_v1, %v990_v1  ;;  %v1011_v10 = vadd.f32 %v3275_v3, %v4228_v27 }
 0x3ed   :  { %v1002_v6 = vpop.f32.mrf.mxu1  ;;  %3348 = vmatpush3.bf16.msra.mxu0 %v3532_v31 }
 0x3ee   :  { %3001 = vst [vmem:[#allocation25 + $0x20] sm:$0xff] %v4261_v4   ;;  %v1003_v7 = vadd.f32 %v4228_v27, %v1002_v6  ;;  %2266 = vadd.xlane.f32.xlu0 %v2242_v5  ;;  %3301 = vmatprep.mubr.bf16.mxu0 %v4261_v4  ;;  %v2248_v18 = vmul.f32 %v1011_v10, %v1011_v10 }
 0x3ef   :  { %v3276_v9 = vpop.f32.mrf.mxu1  ;;  %3302 = vmatmul.mubr.bf16.gmra.mxu0 %v4257_v0  ;;  %3349 = vmatprep.subr.bf16.mxu0 %v3533_v32 }
 0x3f0   :  { %v1014_v11 = vadd.f32 %v3276_v9, %v4228_v27  ;;  %2268 = vadd.xlane.f32.xlu1 %v2243_v8  ;;  %v2246_v12 = vmul.f32 %v1003_v7, %v1003_v7 }
 0x3f1   :  { %v1005_v13 = vpop.f32.mrf.mxu1  ;;  %3350 = vmatpush3.bf16.msra.mxu0 %v3533_v32 }
 0x3f2   :  { %v4269_v14 = vpack.c.bf16 %v1014_v11, %v1011_v10  ;;  %v1006_v15 = vadd.f32 %v4228_v27, %v1005_v13  ;;  %2274 = vadd.xlane.f32.xlu0 %v2246_v12  ;;  %v2249_v19 = vmul.f32 %v1014_v11, %v1014_v11  ;;  %v3528_v27 = vld [vmem:[#allocation13] sm:$0xff]  }
 0x3f3   :  { %3323 = vmatprep.subr.bf16.mxu1 %v3528_v27 }
 0x3f4   :  { %3004 = vst [vmem:[#allocation25 + $0x38] sm:$0xff] %v4269_v14   ;;  %v4273_v16 = vpack.c.bf16 %v1006_v15, %v1003_v7  ;;  %v2247_v17 = vmul.f32 %v1006_v15, %v1006_v15  ;;  %3324 = vmatpush3.bf16.msra.mxu1 %v3528_v27 }
 0x3f6   :  { %3003 = vst [vmem:[#allocation25 + $0x30] sm:$0xff] %v4273_v16   ;;  %2276 = vadd.xlane.f32.xlu1 %v2247_v17  ;;  %2278 = vadd.xlane.f32.xlu0 %v2248_v18 }
 0x3f7   :  { %3305 = vmatprep.mubr.bf16.mxu0 %v4273_v16 }
 0x3f8   :  { %3306 = vmatmul.mubr.bf16.gmra.mxu0 %v4269_v14 }
 0x3fa   :  { %2280 = vadd.xlane.f32.xlu1 %v2249_v19 }
 0x49f   :  { %v3295_v33 = vpop.f32.mrf.mxu0 }
 0x4a0   :  { %v1427_v40 = vadd.f32 %v3295_v33, %v2708_v35 }
 0x4a1   :  { %v1418_v34 = vpop.f32.mrf.mxu0 }
 0x4a2   :  { %v1419_v38 = vadd.f32 %v2708_v35, %v1418_v34  ;;  %v1483_v48 = vmax.f32 %v1427_v40, 0.0  ;;  %v3534_v34 = vld [vmem:[#allocation14 + $0x10] sm:$0xff]  }
 0x4a3   :  { %v3296_v36 = vpop.f32.mrf.mxu0  ;;  %3351 = vmatprep.subr.bf16.mxu0 %v3534_v34  ;;  %v3546_v40 = vld [vmem:[#allocation16 + $0x30] sm:$0xff]  }
 0x4a4   :  { %v1430_v39 = vadd.f32 %v3296_v36, %v2708_v35  ;;  %v1481_v46 = vmax.f32 %v1419_v38, 0.0  ;;  %3352 = vmatpush3.bf16.msra.mxu0 %v3534_v34  ;;  %v3535_v36 = vld [vmem:[#allocation14 + $0x8] sm:$0xff]   ;;  %v3536_v38 = vld [vmem:[#allocation14] sm:$0xff]  }
 0x4a5   :  { %v1421_v42 = vpop.f32.mrf.mxu0  ;;  %3353 = vmatprep.subr.bf16.mxu0 %v3535_v36 }
 0x4a6   :  { %v1422_v43 = vadd.f32 %v2708_v35, %v1421_v42  ;;  %v1484_v44 = vmax.f32 %v1430_v39, 0.0  ;;  %v4281_v39 = vld [vmem:[#allocation17 + $0x38] sm:$0xff]   ;;  %v3547_v42 = vld [vmem:[#allocation16 + $0x28] sm:$0xff]  }
 0x4a7   :  { %v3299_v45 = vpop.f32.mrf.mxu0 }
 0x4a8   :  { %v1482_v47 = vmax.f32 %v1422_v43, 0.0  ;;  %v1498_v52 = vpack.c.bf16 %v1484_v44, %v1483_v48  ;;  %v1443_v57 = vadd.f32 %v3299_v45, %v2708_v35  ;;  %3354 = vmatpush3.bf16.msra.mxu0 %v3535_v36  ;;  %v3548_v43 = vld [vmem:[#allocation16 + $0x20] sm:$0xff]   ;;  %v3549_v44 = vld [vmem:[#allocation16 + $0x18] sm:$0xff]  }
 0x4a9   :  { %v1434_v49 = vpop.f32.mrf.mxu0  ;;  %3355 = vmatprep.subr.bf16.mxu0 %v3536_v38 }
 0x4aa   :  { %v1497_v51 = vpack.c.bf16 %v1482_v47, %v1481_v46  ;;  %v1435_v55 = vadd.f32 %v2708_v35, %v1434_v49  ;;  %v1487_v1 = vmax.f32 %v1443_v57, 0.0  ;;  %v4287_v47 = vld [vmem:[%s4580_s12] ss:$0 sm:$0xff] }
 0x4ab   :  { %v3300_v53 = vpop.f32.mrf.mxu0 }
 0x4ac   :  { %v1446_v56 = vadd.f32 %v3300_v53, %v2708_v35  ;;  %3325 = vmatprep.mubr.bf16.mxu1 %v1497_v51  ;;  %v1485_v62 = vmax.f32 %v1435_v55, 0.0  ;;  %3356 = vmatpush3.bf16.msra.mxu0 %v3536_v38  ;;  %v4317_v38 = vld [vmem:[#allocation17 + $0x10] sm:$0xff]  }
 0x4ad   :  { %v1437_v58 = vpop.f32.mrf.mxu0  ;;  %3326 = vmatmul.mubr.bf16.vlgmr.msra.gmra.mxu1 %v1498_v52  ;;  %3405 = vmatprep.subr.bf16.mxu0 %v4281_v39 }
 0x4ae   :  { %v1438_v59 = vadd.f32 %v2708_v35, %v1437_v58  ;;  %v1488_v60 = vmax.f32 %v1446_v56, 0.0 }
 0x4af   :  { %v3303_v61 = vpop.f32.mrf.mxu0 }
 0x4b0   :  { %v1486_v63 = vmax.f32 %v1438_v59, 0.0  ;;  %v1500_v5 = vpack.c.bf16 %v1488_v60, %v1487_v1  ;;  %v1459_v9 = vadd.f32 %v3303_v61, %v2708_v35 }
 0x4b1   :  { %v1450_v2 = vpop.f32.mrf.mxu0 }
 0x4b2   :  { %v1499_v3 = vpack.c.bf16 %v1486_v63, %v1485_v62  ;;  %v1451_v7 = vadd.f32 %v2708_v35, %v1450_v2  ;;  %v1491_v18 = vmax.f32 %v1459_v9, 0.0  ;;  %v4293_v2 = vld [vmem:[#allocation17 + $0x30] sm:$0xff]  }
 0x4b3   :  { %v3304_v6 = vpop.f32.mrf.mxu0 }
 0x4b4   :  { %v1462_v8 = vadd.f32 %v3304_v6, %v2708_v35  ;;  %3329 = vmatprep.mubr.bf16.mxu1 %v1499_v3  ;;  %v1489_v13 = vmax.f32 %v1451_v7, 0.0 }
 0x4b5   :  { %v1453_v10 = vpop.f32.mrf.mxu0  ;;  %3330 = vmatmul.mubr.bf16.gmra.mxu1 %v1500_v5 }
 0x4b6   :  { %v1454_v11 = vadd.f32 %v2708_v35, %v1453_v10  ;;  %v1492_v12 = vmax.f32 %v1462_v8, 0.0 }
 0x4b8   :  { %v1490_v15 = vmax.f32 %v1454_v11, 0.0  ;;  %v3307_v17 = vpop.f32.mrf.mxu0  ;;  %v1502_v21 = vpack.c.bf16 %v1492_v12, %v1491_v18  ;;  %v4301_v11 = vld [vmem:[#allocation17 + $0x28] sm:$0xff]  }
 0x4b9   :  { %v1475_v25 = vadd.f32 %v3307_v17, %v2708_v35 }
 0x4ba   :  { %v1501_v19 = vpack.c.bf16 %v1490_v15, %v1489_v13  ;;  %v1466_v20 = vpop.f32.mrf.mxu0 }
 0x4bb   :  { %v1467_v23 = vadd.f32 %v2708_v35, %v1466_v20  ;;  %v1495_v31 = vmax.f32 %v1475_v25, 0.0 }
 0x4bc   :  { %v3308_v22 = vpop.f32.mrf.mxu0  ;;  %3333 = vmatprep.mubr.bf16.mxu1 %v1501_v19 }
 0x4bd   :  { %v1478_v24 = vadd.f32 %v3308_v22, %v2708_v35  ;;  %3334 = vmatmul.mubr.bf16.gmra.mxu1 %v1502_v21  ;;  %v1493_v29 = vmax.f32 %v1467_v23, 0.0  ;;  %v4305_v21 = vld [vmem:[#allocation17 + $0x20] sm:$0xff]  }
 0x4be   :  { %v1469_v26 = vpop.f32.mrf.mxu0 }
 0x4bf   :  { %v1470_v27 = vadd.f32 %v2708_v35, %v1469_v26  ;;  %v1496_v28 = vmax.f32 %v1478_v24, 0.0  ;;  %v3545_v35 = vld [vmem:[#allocation16 + $0x38] sm:$0xff]  }
 0x4c0   :  { %3373 = vmatprep.subr.bf16.mxu1 %v3545_v35 }
 0x4c1   :  { %v1494_v30 = vmax.f32 %v1470_v27, 0.0  ;;  %v1504_v33 = vpack.c.bf16 %v1496_v28, %v1495_v31  ;;  %3374 = vmatpush3.bf16.msra.mxu1 %v3545_v35  ;;  %v4313_v28 = vld [vmem:[#allocation17 + $0x18] sm:$0xff]  }
 0x4c2   :  { %3375 = vmatprep.subr.bf16.mxu1 %v3546_v40 }
 0x4c3   :  { %v1503_v32 = vpack.c.bf16 %v1494_v30, %v1493_v29 }
 0x4c5   :  { %3337 = vmatprep.mubr.bf16.mxu1 %v1503_v32  ;;  %3376 = vmatpush3.bf16.msra.mxu1 %v3546_v40 }
 0x4c6   :  { %3338 = vmatmul.mubr.bf16.gmra.mxu1 %v1504_v33  ;;  %3377 = vmatprep.subr.bf16.mxu1 %v3547_v42 }
 0x4c9   :  { %3378 = vmatpush3.bf16.msra.mxu1 %v3547_v42 }
 0x4ca   :  { %3379 = vmatprep.subr.bf16.mxu1 %v3548_v43 }
 0x4cd   :  { %3380 = vmatpush3.bf16.msra.mxu1 %v3548_v43 }
 0x4ce   :  { %3381 = vmatprep.subr.bf16.mxu1 %v3549_v44 }
 0x4d1   :  { %3382 = vmatpush3.bf16.msra.mxu1 %v3549_v44 }
 0x56d   :  { %v3327_v45 = vpop.f32.mrf.mxu1 }
 0x56e   :  { %v1619_v52 = vadd.f32 %v3327_v45, %v4287_v47 }
 0x56f   :  { %v1610_v46 = vpop.f32.mrf.mxu1 }
 0x570   :  { %v1611_v49 = vadd.f32 %v4287_v47, %v1610_v46  ;;  %v1675_v60 = vmax.f32 %v1619_v52, 0.0  ;;  %v4325_v46 = vld [vmem:[#allocation17 + $0x8] sm:$0xff]  }
 0x571   :  { %v3328_v48 = vpop.f32.mrf.mxu1 }
 0x572   :  { %v1622_v51 = vadd.f32 %v3328_v48, %v4287_v47  ;;  %v1673_v58 = vmax.f32 %v1611_v49, 0.0 }
 0x573   :  { %v1613_v53 = vpop.f32.mrf.mxu1 }
 0x574   :  { %v1614_v55 = vadd.f32 %v4287_v47, %v1613_v53  ;;  %v1676_v56 = vmax.f32 %v1622_v51, 0.0 }
 0x575   :  { %v3331_v57 = vpop.f32.mrf.mxu1 }
 0x576   :  { %v1674_v59 = vmax.f32 %v1614_v55, 0.0  ;;  %v1690_v63 = vpack.c.bf16 %v1676_v56, %v1675_v60  ;;  %v1635_v6 = vadd.f32 %v3331_v57, %v4287_v47  ;;  %v4329_v56 = vld [vmem:[#allocation17] sm:$0xff]   ;;  %v3551_v57 = vld [vmem:[#allocation16 + $0x8] sm:$0xff]  }
 0x577   :  { %v1626_v61 = vpop.f32.mrf.mxu1 }
 0x578   :  { %v1689_v62 = vpack.c.bf16 %v1674_v59, %v1673_v58  ;;  %v1627_v3 = vadd.f32 %v4287_v47, %v1626_v61  ;;  %v1679_v15 = vmax.f32 %v1635_v6, 0.0  ;;  %v3552_v58 = vld [vmem:[#allocation16] sm:$0xff]  }
 0x579   :  { %v3332_v1 = vpop.f32.mrf.mxu1 }
 0x57a   :  { %v1638_v5 = vadd.f32 %v3332_v1, %v4287_v47  ;;  %3357 = vmatprep.mubr.bf16.mxu0 %v1689_v62  ;;  %v1677_v12 = vmax.f32 %v1627_v3, 0.0 }
 0x57b   :  { %v1629_v7 = vpop.f32.mrf.mxu1  ;;  %3358 = vmatmul.mubr.bf16.vlgmr.msra.gmra.mxu0 %v1690_v63 }
 0x57c   :  { %v1630_v8 = vadd.f32 %v4287_v47, %v1629_v7  ;;  %3406 = vmatpush3.bf16.msra.mxu0 %v4281_v39  ;;  %v1680_v9 = vmax.f32 %v1638_v5, 0.0 }
 0x57d   :  { %v3335_v10 = vpop.f32.mrf.mxu1  ;;  %3407 = vmatprep.subr.bf16.mxu0 %v4293_v2 }
 0x57e   :  { %v1678_v13 = vmax.f32 %v1630_v8, 0.0  ;;  %v1692_v19 = vpack.c.bf16 %v1680_v9, %v1679_v15  ;;  %v1651_v24 = vadd.f32 %v3335_v10, %v4287_v47 }
 0x57f   :  { %v1642_v17 = vpop.f32.mrf.mxu1 }
 0x580   :  { %v1691_v18 = vpack.c.bf16 %v1678_v13, %v1677_v12  ;;  %3408 = vmatpush3.bf16.msra.mxu0 %v4293_v2  ;;  %v1643_v22 = vadd.f32 %v4287_v47, %v1642_v17  ;;  %v1683_v32 = vmax.f32 %v1651_v24, 0.0 }
 0x581   :  { %v3336_v20 = vpop.f32.mrf.mxu1  ;;  %3409 = vmatprep.subr.bf16.mxu0 %v4301_v11 }
 0x582   :  { %v1654_v23 = vadd.f32 %v3336_v20, %v4287_v47  ;;  %3361 = vmatprep.mubr.bf16.mxu0 %v1691_v18  ;;  %v1681_v29 = vmax.f32 %v1643_v22, 0.0 }
 0x583   :  { %v1645_v25 = vpop.f32.mrf.mxu1  ;;  %3362 = vmatmul.mubr.bf16.gmra.mxu0 %v1692_v19 }
 0x584   :  { %v1646_v26 = vadd.f32 %v4287_v47, %v1645_v25  ;;  %3410 = vmatpush3.bf16.msra.mxu0 %v4301_v11  ;;  %v1684_v27 = vmax.f32 %v1654_v23, 0.0 }
 0x585   :  { %3411 = vmatprep.subr.bf16.mxu0 %v4305_v21 }
 0x586   :  { %v1682_v30 = vmax.f32 %v1646_v26, 0.0  ;;  %v3339_v31 = vpop.f32.mrf.mxu1  ;;  %v1694_v36 = vpack.c.bf16 %v1684_v27, %v1683_v32 }
 0x587   :  { %v1667_v43 = vadd.f32 %v3339_v31, %v4287_v47 }
 0x588   :  { %v1693_v33 = vpack.c.bf16 %v1682_v30, %v1681_v29  ;;  %v1658_v34 = vpop.f32.mrf.mxu1  ;;  %3412 = vmatpush3.bf16.msra.mxu0 %v4305_v21 }
 0x589   :  { %3413 = vmatprep.subr.bf16.mxu0 %v4313_v28  ;;  %v1659_v40 = vadd.f32 %v4287_v47, %v1658_v34  ;;  %v1687_v52 = vmax.f32 %v1667_v43, 0.0 }
 0x58a   :  { %v3340_v35 = vpop.f32.mrf.mxu1  ;;  %3365 = vmatprep.mubr.bf16.mxu0 %v1693_v33 }
 0x58b   :  { %v1670_v42 = vadd.f32 %v3340_v35, %v4287_v47  ;;  %3366 = vmatmul.mubr.bf16.gmra.mxu0 %v1694_v36  ;;  %v1685_v49 = vmax.f32 %v1659_v40, 0.0 }
 0x58c   :  { %v1661_v44 = vpop.f32.mrf.mxu1  ;;  %3414 = vmatpush3.bf16.msra.mxu0 %v4313_v28 }
 0x58d   :  { %v1662_v45 = vadd.f32 %v4287_v47, %v1661_v44  ;;  %3415 = vmatprep.subr.bf16.mxu0 %v4317_v38  ;;  %v1688_v48 = vmax.f32 %v1670_v42, 0.0  ;;  %v3550_v47 = vld [vmem:[#allocation16 + $0x10] sm:$0xff]  }
 0x58e   :  { %3383 = vmatprep.subr.bf16.mxu1 %v3550_v47 }
 0x58f   :  { %v1686_v51 = vmax.f32 %v1662_v45, 0.0  ;;  %v1696_v55 = vpack.c.bf16 %v1688_v48, %v1687_v52  ;;  %3384 = vmatpush3.bf16.msra.mxu1 %v3550_v47  ;;  %v2255_v48 = vpop.xlane.xlu1 %2254 }
 0x590   :  { %3416 = vmatpush3.bf16.msra.mxu0 %v4317_v38  ;;  %3385 = vmatprep.subr.bf16.mxu1 %v3551_v57 }
 0x591   :  { %v1695_v53 = vpack.c.bf16 %v1686_v51, %v1685_v49  ;;  %3417 = vmatprep.subr.bf16.mxu0 %v4325_v46 }
 0x593   :  { %3369 = vmatprep.mubr.bf16.mxu0 %v1695_v53  ;;  %3386 = vmatpush3.bf16.msra.mxu1 %v3551_v57 }
 0x594   :  { %3370 = vmatmul.mubr.bf16.gmra.mxu0 %v1696_v55  ;;  %3387 = vmatprep.subr.bf16.mxu1 %v3552_v58  ;;  %v4369_v55 = vld [vmem:[%s4586_s18] ss:$0 sm:$0xff] }
 0x595   :  { %3418 = vmatpush3.bf16.msra.mxu0 %v4325_v46  ;;  %3421 = vmatprep.mubr.bf16.mxu0 %v4237_v41 }
 0x596   :  { %3419 = vmatprep.subr.bf16.mxu0 %v4329_v56 }
 0x597   :  { %3388 = vmatpush3.bf16.msra.mxu1 %v3552_v58 }
 0x598   :  { %3437 = vmatprep.subr.bf16.mxu1 %v4281_v39 }
 0x599   :  { %3420 = vmatpush3.bf16.msra.mxu0 %v4329_v56 }
 0x59c   :  { %3422 = vmatmul.mubr.bf16.vlgmr.msra.gmra.mxu0 %v4233_v37  ;;  %v4342_v37 = vld [vmem:[%s4582_s14] ss:$0 sm:$0xff] }
 0x59d   :  { %3425 = vmatprep.mubr.bf16.mxu0 %v4249_v54 }
 0x5a4   :  { %3426 = vmatmul.mubr.bf16.gmra.mxu0 %v4245_v50 }
 0x63b   :  { %v3359_v41 = vpop.f32.mrf.mxu0 }
 0x63c   :  { %v1811_v61 = vadd.f32 %v3359_v41, %v4342_v37 }
 0x63d   :  { %v1802_v59 = vpop.f32.mrf.mxu0 }
 0x63e   :  { %v1803_v50 = vadd.f32 %v4342_v37, %v1802_v59  ;;  %v1867_v7 = vmax.f32 %v1811_v61, 0.0  ;;  %v2291_v59 = vadd.f32 %v4369_v55, %v2255_v48 }
 0x63f   :  { %v3360_v54 = vpop.f32.mrf.mxu0 }
 0x640   :  { %v1814_v60 = vadd.f32 %v3360_v54, %v4342_v37  ;;  %v1865_v5 = vmax.f32 %v1803_v50, 0.0  ;;  %v2257_v54 = vpop.xlane.xlu1 %2256 }
 0x641   :  { %v1805_v62 = vpop.f32.mrf.mxu0 }
 0x642   :  { %v1806_v63 = vadd.f32 %v4342_v37, %v1805_v62  ;;  %v1868_v1 = vmax.f32 %v1814_v60, 0.0 }
 0x643   :  { %v3363_v3 = vpop.f32.mrf.mxu0 }
 0x644   :  { %v1866_v6 = vmax.f32 %v1806_v63, 0.0  ;;  %v1882_v10 = vpack.c.bf16 %v1868_v1, %v1867_v7  ;;  %v1827_v17 = vadd.f32 %v3363_v3, %v4342_v37 }
 0x645   :  { %v1818_v8 = vpop.f32.mrf.mxu0 }
 0x646   :  { %v1881_v9 = vpack.c.bf16 %v1866_v6, %v1865_v5  ;;  %v1819_v13 = vadd.f32 %v4342_v37, %v1818_v8  ;;  %v1871_v25 = vmax.f32 %v1827_v17, 0.0  ;;  %v2292_v8 = vadd.f32 %v4369_v55, %v2257_v54 }
 0x647   :  { %v3364_v12 = vpop.f32.mrf.mxu0 }
 0x648   :  { %v1830_v15 = vadd.f32 %v3364_v12, %v4342_v37  ;;  %3389 = vmatprep.mubr.bf16.mxu1 %v1881_v9  ;;  %v1869_v23 = vmax.f32 %v1819_v13, 0.0  ;;  %v2265_v9 = vpop.xlane.xlu1 %2264 }
 0x649   :  { %v1821_v18 = vpop.f32.mrf.mxu0  ;;  %3390 = vmatmul.mubr.bf16.vlgmr.msra.gmra.mxu1 %v1882_v10 }
 0x64a   :  { %v1822_v19 = vadd.f32 %v4342_v37, %v1821_v18  ;;  %3445 = vmatpush3.bf16.msra.mxu1 %v4281_v39  ;;  %v1872_v20 = vmax.f32 %v1830_v15, 0.0  ;;  %v2251_v39 = vpop.xlane.xlu0 %2250 }
 0x64b   :  { %v3367_v22 = vpop.f32.mrf.mxu0  ;;  %3438 = vmatprep.subr.bf16.mxu1 %v4293_v2  ;;  %v2289_v3 = vadd.f32 %v4369_v55, %v2251_v39 }
 0x64c   :  { %v1870_v24 = vmax.f32 %v1822_v19, 0.0  ;;  %v1884_v29 = vpack.c.bf16 %v1872_v20, %v1871_v25  ;;  %v1843_v33 = vadd.f32 %v3367_v22, %v4342_v37 }
 0x64d   :  { %v1834_v26 = vpop.f32.mrf.mxu0 }
 0x64e   :  { %v1883_v27 = vpack.c.bf16 %v1870_v24, %v1869_v23  ;;  %3446 = vmatpush3.bf16.msra.mxu1 %v4293_v2  ;;  %v1835_v31 = vadd.f32 %v4342_v37, %v1834_v26  ;;  %v1875_v43 = vmax.f32 %v1843_v33, 0.0  ;;  %v2253_v49 = vpop.xlane.xlu0 %2252  ;;  %v2296_v33 = vadd.f32 %v4369_v55, %v2265_v9 }
 0x64f   :  { %v3368_v30 = vpop.f32.mrf.mxu0  ;;  %3439 = vmatprep.subr.bf16.mxu1 %v4301_v11  ;;  %v2290_v15 = vadd.f32 %v4369_v55, %v2253_v49 }
 0x650   :  { %v1846_v32 = vadd.f32 %v3368_v30, %v4342_v37  ;;  %3393 = vmatprep.mubr.bf16.mxu1 %v1883_v27  ;;  %v1873_v2 = vmax.f32 %v1835_v31, 0.0 }
 0x651   :  { %v1837_v34 = vpop.f32.mrf.mxu0  ;;  %3394 = vmatmul.mubr.bf16.gmra.mxu1 %v1884_v29 }
 0x652   :  { %v1838_v36 = vadd.f32 %v4342_v37, %v1837_v34  ;;  %3447 = vmatpush3.bf16.msra.mxu1 %v4301_v11  ;;  %v1876_v35 = vmax.f32 %v1846_v32, 0.0  ;;  %v2263_v50 = vpop.xlane.xlu0 %2262  ;;  %v2261_v32 = vpop.xlane.xlu1 %2260 }
 0x653   :  { %3440 = vmatprep.subr.bf16.mxu1 %v4305_v21  ;;  %v2295_v27 = vadd.f32 %v4369_v55, %v2263_v50 }
 0x654   :  { %v1874_v40 = vmax.f32 %v1838_v36, 0.0  ;;  %v3371_v42 = vpop.f32.mrf.mxu0  ;;  %v1886_v51 = vpack.c.bf16 %v1876_v35, %v1875_v43  ;;  %v2401_v35 = vlaneseq  ;;  %v2294_v43 = vadd.f32 %v4369_v55, %v2261_v32 }
 0x655   :  { %v1859_v47 = vadd.f32 %v3371_v42, %v4342_v37 }
 0x656   :  { %v1885_v44 = vpack.c.bf16 %v1874_v40, %v1873_v2  ;;  %v1850_v45 = vpop.f32.mrf.mxu0  ;;  %3448 = vmatpush3.bf16.msra.mxu1 %v4305_v21  ;;  %v2259_v17 = vpop.xlane.xlu0 %2258 }
 0x657   :  { %3441 = vmatprep.subr.bf16.mxu1 %v4313_v28  ;;  %v1851_v11 = vadd.f32 %v4342_v37, %v1850_v45  ;;  %v1879_v63 = vmax.f32 %v1859_v47, 0.0  ;;  %v2293_v29 = vadd.f32 %v4369_v55, %v2259_v17 }
 0x658   :  { %v3372_v52 = vpop.f32.mrf.mxu0  ;;  %3397 = vmatprep.mubr.bf16.mxu1 %v1885_v44 }
 0x659   :  { %v1862_v53 = vadd.f32 %v3372_v52, %v4342_v37  ;;  %3398 = vmatmul.mubr.bf16.gmra.mxu1 %v1886_v51  ;;  %v1877_v60 = vmax.f32 %v1851_v11, 0.0  ;;  %v4391_v52 = vand.u32 127, %v2401_v35 }
 0x65a   :  { %v1853_v21 = vpop.f32.mrf.mxu0  ;;  %3449 = vmatpush3.bf16.msra.mxu1 %v4313_v28 }
 0x65b   :  { %v1854_v57 = vadd.f32 %v4342_v37, %v1853_v21  ;;  %3442 = vmatprep.subr.bf16.mxu1 %v4317_v38  ;;  %v1880_v58 = vmax.f32 %v1862_v53, 0.0  ;;  %vm2403_vm0 = vcmp.lt.s32.totalorder %v4391_v52, 4 }
 0x65c   :  { %v3423_v41 = vpop.f32.mrf.mxu0 }
 0x65d   :  { %v1878_v61 = vmax.f32 %v1854_v57, 0.0  ;;  %v2307_v62 = vmul.f32 2.0, %v3423_v41  ;;  %v1888_v6 = vpack.c.bf16 %v1880_v58, %v1879_v63 }
 0x65e   :  { %3450 = vmatpush3.bf16.msra.mxu1 %v4317_v38  ;;  %v2171_v1 = vpop.f32.mrf.mxu0 }
 0x65f   :  { %v1887_v28 = vpack.c.bf16 %v1878_v61, %v1877_v60  ;;  %v2323_v5 = vsub.f32 %v2291_v59, %v2307_v62  ;;  %v2305_v37 = vmul.f32 2.0, %v2171_v1  ;;  %3443 = vmatprep.subr.bf16.mxu1 %v4325_v46 }
 0x660   :  { %v3424_v7 = vpop.f32.mrf.mxu0 }
 0x661   :  { %v2339_v10 = vmax.f32 %v2323_v5, 0.0  ;;  %v2321_v12 = vsub.f32 %v2289_v3, %v2305_v37  ;;  %v2308_v13 = vmul.f32 2.0, %v3424_v7  ;;  %3401 = vmatprep.mubr.bf16.mxu1 %v1887_v28  ;;  %v4428_v7 = vpop.xlane.xlu1 %2272 }
 0x662   :  { %3402 = vmatmul.mubr.bf16.gmra.mxu1 %v1888_v6  ;;  %v2174_v38 = vpop.f32.mrf.mxu0  ;;  %v4426_v6 = vpop.xlane.xlu0 %2270 }
 0x663   :  { %v2355_v18 = vadd.f32 1.0, %v2339_v10  ;;  %v2337_v19 = vmax.f32 %v2321_v12, 0.0  ;;  %v2324_v20 = vsub.f32 %v2292_v8, %v2308_v13  ;;  %3451 = vmatpush3.bf16.msra.mxu1 %v4325_v46  ;;  %v2306_v22 = vmul.f32 2.0, %v2174_v38  ;;  %3429 = vmatprep.mubr.bf16.mxu1 %v4261_v4 }
 0x664   :  { %v3427_v23 = vpop.f32.mrf.mxu0  ;;  %3444 = vmatprep.subr.bf16.mxu1 %v4329_v56 }
 0x665   :  { %3553 = vrcp.f32 %v2355_v18  ;;  %v2353_v24 = vadd.f32 1.0, %v2337_v19  ;;  %v2340_v25 = vmax.f32 %v2324_v20, 0.0  ;;  %v2322_v26 = vsub.f32 %v2290_v15, %v2306_v22  ;;  %v4432_v9 = vpop.xlane.xlu1 %2268  ;;  %v4445_v22 = vld [vmem:[%s4584_s16] ss:$0 sm:$0xff]  ;;  %s3969_s16 = smov [#allocation20]  }
 0x666   :  { %v2311_v30 = vmul.f32 2.0, %v3427_v23  ;;  %v2187_v31 = vpop.f32.mrf.mxu0  ;;  %v4430_v8 = vpop.xlane.xlu0 %2266  ;;  %s2517_s15 = sshll.u32 %s3969_s16, 4  ;;  %s2518_s15 = int_to_ptr.vmem [resolvable:$true] %s2517_s15 }
 0x667   :  { %3555 = vrcp.f32 %v2353_v24  ;;  %v2356_v39 = vadd.f32 1.0, %v2340_v25  ;;  %v2338_v46 = vmax.f32 %v2322_v26, 0.0  ;;  %3452 = vmatpush3.bf16.msra.mxu1 %v4329_v56  ;;  %v2309_v4 = vmul.f32 2.0, %v2187_v31  ;;  %s3817_s9 = scalar_lea.vmem %s2518_s15, 1024  ;;  %p3822_p9 = scmp.lt.s32.totalorder %s2518_s15, %s2518_s15 }
 0x668   :  { %v2327_v34 = vsub.f32 %v2295_v27, %v2311_v30  ;;  %v3428_v36 = vpop.f32.mrf.mxu0  ;;  %p3818_p8 = scmp.ne.s32.totalorder %s2518_s15, %s3817_s9  ;;  %p3823_p10 = scmp.lt.s32.totalorder %s3817_s9, %s3817_s9 }
 0x669   :  { %3557 = vrcp.f32 %v2356_v39  ;;  %v2354_v2 = vadd.f32 1.0, %v2338_v46  ;;  %v2325_v40 = vsub.f32 %v2293_v29, %v2309_v4  ;;  %v2312_v42 = vmul.f32 2.0, %v3428_v36  ;;  %v4436_v12 = vpop.xlane.xlu1 %2276 }
 0x66a   :  { %v2343_v44 = vmax.f32 %v2327_v34, 0.0  ;;  %v2190_v45 = vpop.f32.mrf.mxu0  ;;  %3430 = vmatmul.mubr.bf16.vlgmr.msra.gmra.mxu1 %v4257_v0  ;;  %v4434_v10 = vpop.xlane.xlu0 %2274  ;;  %p3824_p11 = por %p3823_p10, %p3822_p9 }
 0x66b   :  { %3559 = vrcp.f32 %v2354_v2  ;;  %v2341_v48 = vmax.f32 %v2325_v40, 0.0  ;;  %v2328_v49 = vsub.f32 %v2296_v33, %v2312_v42  ;;  %v2310_v56 = vmul.f32 2.0, %v2190_v45  ;;  %3433 = vmatprep.mubr.bf16.mxu1 %v4273_v16 }
 0x66c   :  { %v2359_v51 = vadd.f32 1.0, %v2343_v44  ;;  %p3825_p12 = pnand %p3824_p11, %p3818_p8 }
 0x66d   :  { %v2357_v11 = vadd.f32 1.0, %v2341_v48  ;;  %v2344_v53 = vmax.f32 %v2328_v49, 0.0  ;;  %v2326_v47 = vsub.f32 %v2294_v43, %v2310_v56  ;;  %v4440_v15 = vpop.xlane.xlu1 %2280 }
 0x66e   :  { %3561 = vrcp.f32 %v2359_v51  ;;  %v4438_v13 = vpop.xlane.xlu0 %2278 }
 0x66f   :  { %v2360_v21 = vadd.f32 1.0, %v2344_v53  ;;  %v2342_v57 = vmax.f32 %v2326_v47, 0.0  ;;  %3563 = vrcp.f32 %v2357_v11 }
 0x671   :  { %3565 = vrcp.f32 %v2360_v21  ;;  %v2358_v0 = vadd.f32 1.0, %v2342_v57 }
 0x672   :  { %v3554_v58 = vpop.eup %3553  ;;  %3434 = vmatmul.mubr.bf16.gmra.mxu1 %v4269_v14 }
 0x673   :  { %3567 = vrcp.f32 %v2358_v0  ;;  %v2406_v16 = vsel %vm2403_vm0, %v3554_v58, 0.0 }
 0x674   :  { %v3556_v41 = vpop.eup %3555  ;;  %2424 = vadd.xlane.f32.xlu0 %v2406_v16 }
 0x675   :  { %v2404_v54 = vsel %vm2403_vm0, %v3556_v41, 0.0 }
 0x676   :  { %v3558_v59 = vpop.eup %3557 }
 0x677   :  { %v2407_v50 = vsel %vm2403_vm0, %v3558_v59, 0.0 }
 0x678   :  { %v3560_v60 = vpop.eup %3559  ;;  %2420 = vadd.xlane.f32.xlu0 %v2404_v54  ;;  %2426 = vadd.xlane.f32.xlu1 %v2407_v50 }
 0x679   :  { %v4403_v14 = vsel %vm2403_vm0, %v3560_v60, 0.0 }
 0x67b   :  { %v3562_v61 = vpop.eup %3561 }
 0x67c   :  { %2422 = vadd.xlane.f32.xlu1 %v4403_v14  ;;  %v4408_v62 = vsel %vm2403_vm0, %v3562_v61, 0.0  ;;  %v3564_v63 = vpop.eup %3563 }
 0x67d   :  { %2432 = vadd.xlane.f32.xlu0 %v4408_v62  ;;  %v4417_v5 = vsel %vm2403_vm0, %v3564_v63, 0.0 }
 0x67e   :  { %v3566_v1 = vpop.eup %3565 }
 0x67f   :  { %v4413_v3 = vsel %vm2403_vm0, %v3566_v1, 0.0 }
 0x680   :  { %v3568_v28 = vpop.eup %3567  ;;  %2434 = vadd.xlane.f32.xlu1 %v4413_v3 }
 0x681   :  { %2428 = vadd.xlane.f32.xlu0 %v4417_v5  ;;  %v4423_v37 = vsel %vm2403_vm0, %v3568_v28, 0.0 }
 0x684   :  { %2430 = vadd.xlane.f32.xlu1 %v4423_v37 }
 0x6fd   :  { %v2425_v38 = vpop.xlane.xlu0 %2424 }
 0x6fe   :  { %3569 = vrcp.f32 %v2425_v38 }
 0x701   :  { %v2421_v17 = vpop.xlane.xlu0 %2420  ;;  %v2427_v18 = vpop.xlane.xlu1 %2426 }
 0x702   :  { %3571 = vrcp.f32 %v2421_v17 }
 0x703   :  { %3573 = vrcp.f32 %v2427_v18 }
 0x705   :  { %v2423_v19 = vpop.xlane.xlu1 %2422 }
 0x706   :  { %3575 = vrcp.f32 %v2423_v19  ;;  %v2433_v20 = vpop.xlane.xlu0 %2432 }
 0x707   :  { %3577 = vrcp.f32 %v2433_v20  ;;  %v2299_v20 = vadd.f32 %v4369_v55, %v4426_v6 }
 0x709   :  { %v2435_v23 = vpop.xlane.xlu1 %2434  ;;  %v3391_v24 = vpop.f32.mrf.mxu1 }
 0x70a   :  { %v2429_v25 = vpop.xlane.xlu0 %2428  ;;  %3579 = vrcp.f32 %v2435_v23  ;;  %v2003_v26 = vadd.f32 %v3391_v24, %v4445_v22 }
 0x70b   :  { %v3570_v27 = vpop.eup %3569  ;;  %3581 = vrcp.f32 %v2429_v25  ;;  %v1994_v29 = vpop.f32.mrf.mxu1  ;;  %v2297_v25 = vadd.f32 %v4369_v55, %v4430_v8 }
 0x70c   :  { %v2457_v30 = vmul.f32 %v3570_v27, %v2406_v16  ;;  %2059 = vst [vmem:[#allocation19 + $0x10] sm:$0xff] %v2003_v26  ;;  %v1995_v31 = vadd.f32 %v4445_v22, %v1994_v29 }
 0x70d   :  { %v2431_v32 = vpop.xlane.xlu1 %2430  ;;  %v3392_v39 = vpop.f32.mrf.mxu1 }
 0x70e   :  { %2486 = vst [vmem:[#allocation26 + $0x10] sm:$0xff] %v2457_v30  ;;  %2057 = vst [vmem:[#allocation19] sm:$0xff] %v1995_v31  ;;  %3583 = vrcp.f32 %v2431_v32  ;;  %v2006_v46 = vadd.f32 %v3392_v39, %v4445_v22  ;;  %v2300_v30 = vadd.f32 %v4369_v55, %v4428_v7  ;;  %v2303_v7 = vadd.f32 %v4369_v55, %v4438_v13 }
 0x70f   :  { %v3572_v4 = vpop.eup %3571  ;;  %v1997_v33 = vpop.f32.mrf.mxu1 }
 0x710   :  { %v3574_v34 = vpop.eup %3573  ;;  %v2453_v36 = vmul.f32 %v3572_v4, %v2404_v54  ;;  %2060 = vst [vmem:[#allocation19 + $0x18] sm:$0xff] %v2006_v46  ;;  %v1998_v35 = vadd.f32 %v4445_v22, %v1997_v33 }
 0x711   :  { %v2459_v2 = vmul.f32 %v3574_v34, %v2407_v50  ;;  %v3395_v40 = vpop.f32.mrf.mxu1 }
 0x712   :  { %2484 = vst [vmem:[#allocation26] sm:$0xff] %v2453_v36  ;;  %2058 = vst [vmem:[#allocation19 + $0x8] sm:$0xff] %v1998_v35  ;;  %v2019_v42 = vadd.f32 %v3395_v40, %v4445_v22  ;;  %v2301_v40 = vadd.f32 %v4369_v55, %v4434_v10  ;;  %v2302_v10 = vadd.f32 %v4369_v55, %v4436_v12 }
 0x713   :  { %v3576_v43 = vpop.eup %3575  ;;  %2487 = vst [vmem:[#allocation26 + $0x18] sm:$0xff] %v2459_v2  ;;  %v2010_v44 = vpop.f32.mrf.mxu1 }
 0x714   :  { %v3578_v45 = vpop.eup %3577  ;;  %v2455_v48 = vmul.f32 %v3576_v43, %v4403_v14  ;;  %2063 = vst [vmem:[#allocation19 + $0x30] sm:$0xff] %v2019_v42  ;;  %v2011_v49 = vadd.f32 %v4445_v22, %v2010_v44 }
 0x715   :  { %v2465_v56 = vmul.f32 %v3578_v45, %v4408_v62  ;;  %v3396_v51 = vpop.f32.mrf.mxu1 }
 0x716   :  { %2485 = vst [vmem:[#allocation26 + $0x8] sm:$0xff] %v2455_v48  ;;  %2061 = vst [vmem:[#allocation19 + $0x20] sm:$0xff] %v2011_v49  ;;  %v2022_v11 = vadd.f32 %v3396_v51, %v4445_v22  ;;  %v2304_v48 = vadd.f32 %v4369_v55, %v4440_v15 }
 0x717   :  { %v3580_v53 = vpop.eup %3579  ;;  %2490 = vst [vmem:[#allocation26 + $0x30] sm:$0xff] %v2465_v56  ;;  %v2013_v47 = vpop.f32.mrf.mxu1 }
 0x718   :  { %v3582_v21 = vpop.eup %3581  ;;  %v2467_v57 = vmul.f32 %v3580_v53, %v4413_v3  ;;  %2064 = vst [vmem:[#allocation19 + $0x38] sm:$0xff] %v2022_v11  ;;  %v2014_v0 = vadd.f32 %v4445_v22, %v2013_v47 }
 0x719   :  { %v2461_v58 = vmul.f32 %v3582_v21, %v4417_v5  ;;  %v3399_v16 = vpop.f32.mrf.mxu1 }
 0x71a   :  { %2491 = vst [vmem:[#allocation26 + $0x38] sm:$0xff] %v2467_v57  ;;  %2062 = vst [vmem:[#allocation19 + $0x28] sm:$0xff] %v2014_v0  ;;  %v2035_v41 = vadd.f32 %v3399_v16, %v4445_v22 }
 0x71b   :  { %v3584_v59 = vpop.eup %3583  ;;  %2488 = vst [vmem:[#allocation26 + $0x20] sm:$0xff] %v2461_v58  ;;  %v2026_v54 = vpop.f32.mrf.mxu1 }
 0x71c   :  { %v2463_v50 = vmul.f32 %v3584_v59, %v4423_v37  ;;  %2067 = vst [vmem:[#allocation19 + $0x50] sm:$0xff] %v2035_v41  ;;  %v2027_v60 = vadd.f32 %v4445_v22, %v2026_v54 }
 0x71d   :  { %v3400_v61 = vpop.f32.mrf.mxu1 }
 0x71e   :  { %2489 = vst [vmem:[#allocation26 + $0x28] sm:$0xff] %v2463_v50  ;;  %2065 = vst [vmem:[#allocation19 + $0x40] sm:$0xff] %v2027_v60  ;;  %v2038_v14 = vadd.f32 %v3400_v61, %v4445_v22 }
 0x71f   :  { %v2029_v62 = vpop.f32.mrf.mxu1 }
 0x720   :  { %2068 = vst [vmem:[#allocation19 + $0x58] sm:$0xff] %v2038_v14  ;;  %v2030_v63 = vadd.f32 %v4445_v22, %v2029_v62 }
 0x722   :  { %2066 = vst [vmem:[#allocation19 + $0x48] sm:$0xff] %v2030_v63  ;;  %v3403_v1 = vpop.f32.mrf.mxu1 }
 0x723   :  { %v2051_v3 = vadd.f32 %v3403_v1, %v4445_v22 }
 0x724   :  { %v2042_v28 = vpop.f32.mrf.mxu1 }
 0x725   :  { %2071 = vst [vmem:[#allocation19 + $0x70] sm:$0xff] %v2051_v3  ;;  %v2043_v5 = vadd.f32 %v4445_v22, %v2042_v28 }
 0x726   :  { %v3404_v37 = vpop.f32.mrf.mxu1 }
 0x727   :  { %2069 = vst [vmem:[#allocation19 + $0x60] sm:$0xff] %v2043_v5  ;;  %v2054_v38 = vadd.f32 %v3404_v37, %v4445_v22 }
 0x728   :  { %v2045_v17 = vpop.f32.mrf.mxu1 }
 0x729   :  { %2072 = vst [vmem:[#allocation19 + $0x78] sm:$0xff] %v2054_v38  ;;  %v2046_v18 = vadd.f32 %v4445_v22, %v2045_v17  ;;  %v2298_v22 = vadd.f32 %v4369_v55, %v4432_v9 }
 0x72a   :  { %v3431_v19 = vpop.f32.mrf.mxu1 }
 0x72b   :  { %2070 = vst [vmem:[#allocation19 + $0x68] sm:$0xff] %v2046_v18  ;;  %v2315_v23 = vmul.f32 2.0, %v3431_v19 }
 0x72c   :  { %v2203_v24 = vpop.f32.mrf.mxu1 }
 0x72d   :  { %v2331_v26 = vsub.f32 %v2299_v20, %v2315_v23  ;;  %v2313_v27 = vmul.f32 2.0, %v2203_v24 }
 0x72e   :  { %v3432_v29 = vpop.f32.mrf.mxu1 }
 0x72f   :  { %v2347_v31 = vmax.f32 %v2331_v26, 0.0  ;;  %v2329_v32 = vsub.f32 %v2297_v25, %v2313_v27  ;;  %v2316_v39 = vmul.f32 2.0, %v3432_v29 }
 0x730   :  { %v2206_v46 = vpop.f32.mrf.mxu1 }
 0x731   :  { %v2363_v6 = vadd.f32 1.0, %v2347_v31  ;;  %v2345_v4 = vmax.f32 %v2329_v32, 0.0  ;;  %v2332_v33 = vsub.f32 %v2300_v30, %v2316_v39  ;;  %v2314_v34 = vmul.f32 2.0, %v2206_v46 }
 0x732   :  { %v3435_v36 = vpop.f32.mrf.mxu1 }
 0x733   :  { %3585 = vrcp.f32 %v2363_v6  ;;  %v2361_v8 = vadd.f32 1.0, %v2345_v4  ;;  %v2348_v35 = vmax.f32 %v2332_v33, 0.0  ;;  %v2330_v2 = vsub.f32 %v2298_v22, %v2314_v34 }
 0x734   :  { %v2319_v42 = vmul.f32 2.0, %v3435_v36  ;;  %v2219_v43 = vpop.f32.mrf.mxu1 }
 0x735   :  { %3587 = vrcp.f32 %v2361_v8  ;;  %v2364_v9 = vadd.f32 1.0, %v2348_v35  ;;  %v2346_v44 = vmax.f32 %v2330_v2, 0.0  ;;  %v2317_v45 = vmul.f32 2.0, %v2219_v43 }
 0x736   :  { %v2335_v49 = vsub.f32 %v2303_v7, %v2319_v42  ;;  %v3436_v56 = vpop.f32.mrf.mxu1 }
 0x737   :  { %3589 = vrcp.f32 %v2364_v9  ;;  %v2362_v51 = vadd.f32 1.0, %v2346_v44  ;;  %v2333_v11 = vsub.f32 %v2301_v40, %v2317_v45  ;;  %v2320_v53 = vmul.f32 2.0, %v3436_v56 }
 0x738   :  { %v2351_v47 = vmax.f32 %v2335_v49, 0.0  ;;  %v2222_v13 = vpop.f32.mrf.mxu1 }
 0x739   :  { %3591 = vrcp.f32 %v2362_v51  ;;  %v2349_v21 = vmax.f32 %v2333_v11, 0.0  ;;  %v2336_v57 = vsub.f32 %v2304_v48, %v2320_v53  ;;  %v2318_v0 = vmul.f32 2.0, %v2222_v13 }
 0x73a   :  { %v2367_v58 = vadd.f32 1.0, %v2351_v47 }
 0x73b   :  { %v2365_v16 = vadd.f32 1.0, %v2349_v21  ;;  %v2352_v41 = vmax.f32 %v2336_v57, 0.0  ;;  %v2334_v59 = vsub.f32 %v2302_v10, %v2318_v0 }
 0x73d   :  { %3593 = vrcp.f32 %v2365_v16  ;;  %v2350_v15 = vmax.f32 %v2334_v59, 0.0  ;;  %v2368_v54 = vadd.f32 1.0, %v2352_v41 }
 0x73e   :  { %3595 = vrcp.f32 %v2367_v58 }
 0x73f   :  { %v2366_v50 = vadd.f32 1.0, %v2350_v15 }
 0x740   :  { %v3586_v60 = vpop.eup %3585 }
 0x741   :  { %3597 = vrcp.f32 %v2366_v50  ;;  %v4486_v55 = vsel %vm2403_vm0, %v3586_v60, 0.0 }
 0x742   :  { %v3588_v12 = vpop.eup %3587  ;;  %2440 = vadd.xlane.f32.xlu0 %v4486_v55  ;;  %3599 = vrcp.f32 %v2368_v54 }
 0x743   :  { %v4491_v14 = vsel %vm2403_vm0, %v3588_v12, 0.0 }
 0x744   :  { %v3590_v61 = vpop.eup %3589 }
 0x745   :  { %v4495_v62 = vsel %vm2403_vm0, %v3590_v61, 0.0 }
 0x746   :  { %v3592_v63 = vpop.eup %3591  ;;  %2436 = vadd.xlane.f32.xlu0 %v4491_v14  ;;  %2442 = vadd.xlane.f32.xlu1 %v4495_v62 }
 0x747   :  { %v4501_v1 = vsel %vm2403_vm0, %v3592_v63, 0.0 }
 0x74a   :  { %v3594_v3 = vpop.eup %3593  ;;  %2438 = vadd.xlane.f32.xlu1 %v4501_v1 }
 0x74b   :  { %v4506_v28 = vsel %vm2403_vm0, %v3594_v3, 0.0  ;;  %v3596_v5 = vpop.eup %3595 }
 0x74c   :  { %2444 = vadd.xlane.f32.xlu0 %v4506_v28  ;;  %v4511_v38 = vsel %vm2403_vm0, %v3596_v5, 0.0 }
 0x74e   :  { %v3598_v37 = vpop.eup %3597 }
 0x74f   :  { %v4515_v17 = vsel %vm2403_vm0, %v3598_v37, 0.0  ;;  %v3600_v18 = vpop.eup %3599 }
 0x750   :  { %2448 = vadd.xlane.f32.xlu0 %v4511_v38  ;;  %2446 = vadd.xlane.f32.xlu1 %v4515_v17  ;;  %v4521_v19 = vsel %vm2403_vm0, %v3600_v18, 0.0 }
 0x754   :  { %2450 = vadd.xlane.f32.xlu1 %v4521_v19 }
 0x755   :  { %3828 = shalt.err (!%p3825_p12)
}
 0x756   :  { %2523 = dma.vmem_to_hbm [thread:$0]  %s2518_s15, 1024, %s4588_s20, [#allocation21], %s3959_s2, %s3959_s2, %s3960_s29  }
 0x757   :  { %s3837_s27 = scalar_lea.vmem %s2542_s4, 1024  ;;  %p3842_p0 = scmp.lt.s32.totalorder %s2542_s4, %s2542_s4 }
 0x758   :  { %p3838_p13 = scmp.ne.s32.totalorder %s2542_s4, %s3837_s27  ;;  %p3843_p1 = scmp.lt.s32.totalorder %s3837_s27, %s3837_s27 }
 0x75a   :  { %p3844_p2 = por %p3843_p1, %p3842_p0 }
 0x75c   :  { %p3845_p3 = pnand %p3844_p2, %p3838_p13 }
 0x75e   :  { %3848 = shalt.err (!%p3845_p3)
}
 0x75f   :  { %2547 = dma.vmem_to_hbm [thread:$0]  %s2542_s4, 1024, %s4590_s22, [#allocation24], %s3959_s2, %s3959_s2, %s3960_s29  }
 0x760   :  { %s3971_s6 = smov [#allocation19]  }
 0x761   :  { %s2505_s0 = sshll.u32 %s3971_s6, 4  ;;  %s2506_s0 = int_to_ptr.vmem [resolvable:$true] %s2505_s0 }
 0x762   :  { %s3857_s7 = scalar_lea.vmem %s2506_s0, 2048  ;;  %p3862_p5 = scmp.lt.s32.totalorder %s2506_s0, %s2506_s0 }
 0x763   :  { %p3858_p4 = scmp.ne.s32.totalorder %s2506_s0, %s3857_s7  ;;  %p3863_p6 = scmp.lt.s32.totalorder %s3857_s7, %s3857_s7 }
 0x765   :  { %p3864_p7 = por %p3863_p6, %p3862_p5 }
 0x767   :  { %p3865_p8 = pnand %p3864_p7, %p3858_p4 }
 0x769   :  { %3868 = shalt.err (!%p3865_p8)
}
 0x76a   :  { %s3972_s20 = smov 128   ;;  %s3973_s28 = smov 8  }
 0x76b   :  { %2511 = dma.vmem_to_hbm [thread:$0]  %s2506_s0, 2048, %s4587_s19, [#allocation4], %s3972_s20, %s3972_s20, %s3973_s28  }
 0x76c   :  { %s3974_s22 = smov [#allocation22]   ;;  %s3975_s12 = smov [#allocation25]  }
 0x76d   :  { %s2529_s3 = sshll.u32 %s3974_s22, 4  ;;  %s2553_s11 = sshll.u32 %s3975_s12, 4  ;;  %s2530_s3 = int_to_ptr.vmem [resolvable:$true] %s2529_s3  ;;  %s2554_s11 = int_to_ptr.vmem [resolvable:$true] %s2553_s11 }
 0x76e   :  { %s3877_s14 = scalar_lea.vmem %s2530_s3, 1024  ;;  %p3882_p10 = scmp.lt.s32.totalorder %s2530_s3, %s2530_s3 }
 0x76f   :  { %p3878_p9 = scmp.ne.s32.totalorder %s2530_s3, %s3877_s14  ;;  %p3883_p11 = scmp.lt.s32.totalorder %s3877_s14, %s3877_s14 }
 0x771   :  { %p3884_p12 = por %p3883_p11, %p3882_p10 }
 0x773   :  { %p3885_p13 = pnand %p3884_p12, %p3878_p9 }
 0x775   :  { %3888 = shalt.err (!%p3885_p13)
}
 0x776   :  { %2535 = dma.vmem_to_hbm [thread:$0]  %s2530_s3, 1024, %s4589_s21, [#allocation21], %s3959_s2, %s3959_s2, %s3960_s29  }
 0x777   :  { %s3897_s19 = scalar_lea.vmem %s2554_s11, 1024  ;;  %p3902_p1 = scmp.lt.s32.totalorder %s2554_s11, %s2554_s11 }
 0x778   :  { %p3898_p0 = scmp.ne.s32.totalorder %s2554_s11, %s3897_s19  ;;  %p3903_p2 = scmp.lt.s32.totalorder %s3897_s19, %s3897_s19 }
 0x77a   :  { %p3904_p3 = por %p3903_p2, %p3902_p1 }
 0x77c   :  { %p3905_p4 = pnand %p3904_p3, %p3898_p0 }
 0x77e   :  { %3908 = shalt.err (!%p3905_p4)
}
 0x77f   :  { %2559 = dma.vmem_to_hbm [thread:$0]  %s2554_s11, 1024, %s4591_s23, [#allocation24], %s3959_s2, %s3959_s2, %s3960_s29  }
 0x780   :  { %s3976_s21 = smov [#allocation26]  }
 0x781   :  { %s2565_s23 = sshll.u32 %s3976_s21, 4  ;;  %s2566_s23 = int_to_ptr.vmem [resolvable:$true] %s2565_s23 }
 0x782   :  { %s3917_s2 = scalar_lea.vmem %s2566_s23, 2048  ;;  %p3922_p6 = scmp.lt.s32.totalorder %s2566_s23, %s2566_s23 }
 0x783   :  { %p3918_p5 = scmp.ne.s32.totalorder %s2566_s23, %s3917_s2  ;;  %p3923_p7 = scmp.lt.s32.totalorder %s3917_s2, %s3917_s2 }
 0x785   :  { %p3924_p8 = por %p3923_p7, %p3922_p6 }
 0x787   :  { %p3925_p9 = pnand %p3924_p8, %p3918_p5 }
 0x7cb   :  { %v2441_v52 = vpop.xlane.xlu0 %2440 }
 0x7cc   :  { %3601 = vrcp.f32 %v2441_v52 }
 0x7cf   :  { %v2437_v20 = vpop.xlane.xlu0 %2436  ;;  %v2443_v23 = vpop.xlane.xlu1 %2442 }
 0x7d0   :  { %3603 = vrcp.f32 %v2437_v20 }
 0x7d1   :  { %3605 = vrcp.f32 %v2443_v23 }
 0x7d3   :  { %v2439_v24 = vpop.xlane.xlu1 %2438 }
 0x7d4   :  { %3607 = vrcp.f32 %v2439_v24 }
 0x7d5   :  { %v2445_v25 = vpop.xlane.xlu0 %2444 }
 0x7d6   :  { %3609 = vrcp.f32 %v2445_v25 }
 0x7d9   :  { %v3602_v26 = vpop.eup %3601  ;;  %v2449_v27 = vpop.xlane.xlu0 %2448 }
 0x7da   :  { %v2447_v29 = vpop.xlane.xlu1 %2446  ;;  %v2473_v30 = vmul.f32 %v3602_v26, %v4486_v55  ;;  %3611 = vrcp.f32 %v2449_v27 }
 0x7db   :  { %3613 = vrcp.f32 %v2447_v29 }
 0x7dc   :  { %2494 = vst [vmem:[#allocation26 + $0x50] sm:$0xff] %v2473_v30 }
 0x7dd   :  { %v3604_v31 = vpop.eup %3603 }
 0x7de   :  { %v2451_v32 = vpop.xlane.xlu1 %2450  ;;  %v3606_v39 = vpop.eup %3605  ;;  %v2469_v22 = vmul.f32 %v3604_v31, %v4491_v14 }
 0x7df   :  { %3615 = vrcp.f32 %v2451_v32  ;;  %v2475_v46 = vmul.f32 %v3606_v39, %v4495_v62 }
 0x7e0   :  { %2492 = vst [vmem:[#allocation26 + $0x40] sm:$0xff] %v2469_v22 }
 0x7e1   :  { %v3608_v6 = vpop.eup %3607  ;;  %2495 = vst [vmem:[#allocation26 + $0x58] sm:$0xff] %v2475_v46 }
 0x7e2   :  { %v2471_v4 = vmul.f32 %v3608_v6, %v4501_v1 }
 0x7e3   :  { %v3610_v33 = vpop.eup %3609 }
 0x7e4   :  { %2493 = vst [vmem:[#allocation26 + $0x48] sm:$0xff] %v2471_v4  ;;  %v2477_v34 = vmul.f32 %v3610_v33, %v4506_v28 }
 0x7e6   :  { %2496 = vst [vmem:[#allocation26 + $0x60] sm:$0xff] %v2477_v34 }
 0x7e7   :  { %v3612_v36 = vpop.eup %3611 }
 0x7e8   :  { %v3614_v8 = vpop.eup %3613  ;;  %v2481_v35 = vmul.f32 %v3612_v36, %v4511_v38 }
 0x7e9   :  { %v2479_v2 = vmul.f32 %v3614_v8, %v4515_v17 }
 0x7ea   :  { %2498 = vst [vmem:[#allocation26 + $0x70] sm:$0xff] %v2481_v35 }
 0x7eb   :  { %2497 = vst [vmem:[#allocation26 + $0x68] sm:$0xff] %v2479_v2 }
 0x7ec   :  { %v3616_v40 = vpop.eup %3615 }
 0x7ed   :  { %v2483_v7 = vmul.f32 %v3616_v40, %v4521_v19 }
 0x7ef   :  { %2499 = vst [vmem:[#allocation26 + $0x78] sm:$0xff] %v2483_v7 }
 0x7f0   :  { %3928 = shalt.err (!%p3925_p9)
}
 0x7f1   :  { %2571 = dma.vmem_to_hbm [thread:$0]  %s2566_s23, 2048, %s4592_s24, [#allocation27], %s3972_s20, %s3972_s20, %s3973_s28  }
 0x7f2   :  { %3949 = dma.done.wait [#allocation4], 2048  }
 0x7f3   :  { %3950 = vsyncadd [#allocation4], 4294965248 }
 0x7f4   :  { %3951 = dma.done.wait [#allocation21], 2048  }
 0x7f5   :  { %3952 = vsyncadd [#allocation21], 4294965248 }
 0x7f6   :  { %3953 = dma.done.wait [#allocation24], 2048  }
 0x7f7   :  { %3954 = vsyncadd [#allocation24], 4294965248 }
 0x7f8   :  { %3955 = dma.done.wait [#allocation27], 2048  }
 0x7f9   :  { %3956 = vsyncadd [#allocation27], 4294965248 }
 0x7fa   :  { %2590 = vsyncpa [#allocation3], 1 }
 0x7fb   :  { %2591 = vsyncpa [#allocation6], 1 }
 0x7fc   :  { %2592 = vsyncpa [#allocation9], 1 }
 0x7fd   :  { %2593 = vsyncpa [#allocation12], 1 }
 0x7fe   :  { %2594 = vsyncpa [#allocation15], 1 }
 0x7ff   :  { %2595 = vsyncpa [#allocation18], 1 }
 0x800   :  { %2596 = vsyncpa [#allocation4], 1 }
 0x801   :  { %2597 = vsyncpa [#allocation21], 1 }
 0x802   :  { %2598 = vsyncpa [#allocation24], 1 }
 0x803   :  { %2599 = vsyncpa [#allocation27], 1 }

</bundles_post_ra>
